<compile_context>
chip_gen: v7x
topology: tpu7x:2x2x1
jax: 0.10.0
libtpu: 0.0.40
codegen_flags: <defaults>
</compile_context>

<pallas_src>
import functools
import math

import jax
import jax.numpy as jnp
from jax.experimental import pallas as pl
from jax.experimental.pallas import tpu as pltpu


# ----------------------------------------------------------------------------------------------
# small math helpers (f32, in-kernel)
# ----------------------------------------------------------------------------------------------
def _erf(z):
    # Abramowitz & Stegun 7.1.26 polynomial (|err| < 1.5e-7) — matches nn.GELU(approximate='none')
    # closely while using only exp + basic VPU ops.  Exact divide (perf review: keep approx
    # reciprocal out of the erf path).
    a1, a2, a3, a4, a5 = 0.254829592, -0.284496736, 1.421413741, -1.453152027, 1.061405429
    p = 0.3275911
    sgn = jnp.where(z >= 0.0, 1.0, -1.0)
    az = jnp.abs(z)
    t = 1.0 / (1.0 + p * az)
    poly = ((((a5 * t + a4) * t + a3) * t + a2) * t + a1) * t
    return sgn * (1.0 - poly * jnp.exp(-az * az))


def _gelu_exact(v):
    # PyTorch nn.GELU(approximate='none'): 0.5*x*(1+erf(x/sqrt(2)))
    return 0.5 * v * (1.0 + _erf(v * (1.0 / math.sqrt(2.0))))


def _layernorm(v, g, b, eps=1e-5):
    mu = jnp.mean(v, axis=-1, keepdims=True)
    var = jnp.mean((v - mu) ** 2, axis=-1, keepdims=True)
    return (v - mu) * jax.lax.rsqrt(var + eps) * g + b


# ----------------------------------------------------------------------------------------------
# kernel
# ----------------------------------------------------------------------------------------------
def _cross_perceiver_kernel(
    # block-invariant inputs (indexed only by the batch-split axis)
    x_ref, ctx_ref, amask_ref, indht_ref, gout_ref, bout_ref,
    # per-block parameters (leading num_blocks axis squeezed by the BlockSpec)
    g1_ref, b1_ref, g3_ref, b3_ref,
    wq_ref, wk_ref, bk_ref, wv_ref, bv_ref, wo_ref, bo_ref,
    w1_ref, w2_ref,
    # outputs (VMEM-resident across the sequential axes => used as the carried accumulators)
    xout_ref, amap_ref,
    # scratch: pre_norm3(x1) in bf16, consumed by every FFN chunk of the current block
    x3n_scr,
    *, Bh, Lp, D,
):
    blk = pl.program_id(1)
    ff = pl.program_id(2)
    nblk = pl.num_programs(1)
    nff = pl.num_programs(2)
    bf16 = jnp.bfloat16

    @pl.when((blk == 0) & (ff == 0))
    def _init():
        xout_ref[...] = x_ref[...]
        amap_ref[...] = jnp.zeros_like(amap_ref)

    # ---- cross attention + residual (runs once per block, on the first FFN-chunk step) ----
    @pl.when(ff == 0)
    def _attention():
        xb = xout_ref[...]                                               # (Bh, D) carried latent
        xn = _layernorm(xb, g1_ref[...], b1_ref[...])                    # pre_norm1(x)

        # q: softmax scale already folded into WqT in the wrapper.
        q = jnp.dot(xn.astype(bf16), wq_ref[...],
                    preferred_element_type=jnp.float32)                  # (Bh, D)

        # k / v from the once-normalized bf16 context; per-block g2/b2 folded into Wk/Wv + bias.
        ctx = ctx_ref[...]                                               # (Bh*Lp, C) bf16
        k3 = (jnp.dot(ctx, wk_ref[...], preferred_element_type=jnp.float32)
              + bk_ref[...]).astype(bf16).reshape(Bh, Lp, D)
        v3 = (jnp.dot(ctx, wv_ref[...], preferred_element_type=jnp.float32)
              + bv_ref[...]).astype(bf16).reshape(Bh, Lp, D)

        # Per-head scores, lane-dense over Lp:  s[b,h,l] = sum_{d in head h} q[b,d] * k[b,l,d].
        ind = indht_ref[...]                                             # (H, D) 0/1 f32
        qh = (q[:, None, :] * ind[None, :, :]).astype(bf16)              # (Bh, H, D)
        s = jnp.einsum("bhd,bld->bhl", qh, k3,
                       preferred_element_type=jnp.float32)               # (Bh, H, Lp)
        s = s + amask_ref[...][:, None, :]                               # additive mask (0/-1e30)

        m = jnp.max(s, axis=-1, keepdims=True)
        p = jnp.exp(s - m)
        attn = p * pl.reciprocal(jnp.sum(p, axis=-1, keepdims=True), approx=True)

        # attention_maps += attn summed over heads (single latent token).
        amap_ref[...] += jnp.sum(attn, axis=1)                           # (Bh, Lp)

        # y[b,d] = sum_l attn[b, head(d), l] * v[b,l,d]  (per-head matmul, then indicator collapse)
        yh = jnp.einsum("bhl,bld->bhd", attn.astype(bf16), v3,
                        preferred_element_type=jnp.float32)              # (Bh, H, D)
        y = jnp.sum(yh * ind[None, :, :], axis=1)                        # (Bh, D)

        att_out = jnp.dot(y.astype(bf16), wo_ref[...],
                          preferred_element_type=jnp.float32) + bo_ref[...]
        x1 = xb + att_out                                                # attention residual
        xout_ref[...] = x1
        x3n_scr[...] = _layernorm(x1, g3_ref[...], b3_ref[...]).astype(bf16)

    # ---- FFN chunk: x += GELU(pre_norm3(x1) @ W1[:, chunk]) @ W2[chunk, :]  (every step) ----
    h1 = _gelu_exact(jnp.dot(x3n_scr[...], w1_ref[...],
                             preferred_element_type=jnp.float32))        # (Bh, TDFF)
    xout_ref[...] += jnp.dot(h1.astype(bf16), w2_ref[...],
                             preferred_element_type=jnp.float32)

    @pl.when((blk == nblk - 1) & (ff == nff - 1))
    def _final():
        xout_ref[...] = _layernorm(xout_ref[...], gout_ref[...], bout_ref[...])


# ----------------------------------------------------------------------------------------------
# wrapper
# ----------------------------------------------------------------------------------------------
def _device_kind():
    try:
        return jax.devices()[0].device_kind.lower()
    except Exception:
        return ""


def _vmem_limit_bytes():
    kind = _device_kind()
    if "v7" in kind or "7x" in kind:
        return 40 * 1024 * 1024        # v7x: 64 MiB physical -> leave headroom
    if "v5" in kind or "v6" in kind:
        return 64 * 1024 * 1024        # v5e/v6e: 128 MiB physical
    return 48 * 1024 * 1024            # unknown chip: conservative


def _default_batch_splits(B):
    kind = _device_kind()
    two_core = ("v7" in kind) or ("7x" in kind)
    if two_core and B % 2 == 0 and (B // 2) % 8 == 0:
        return 2
    return 1


def _pick_ffn_tile(dff, target=2048):
    if dff <= target:
        return dff
    t = (min(target, dff) // 128) * 128
    while t >= 128:
        if dff % t == 0:
            return t
        t -= 128
    return dff


def cross_perceiver(x, context, context_mask, params, *, num_heads,
                    batch_splits=None, ffn_tile=None):
    B, D = x.shape
    _, L, C = context.shape
    NB = params["WqT"].shape[0]
    DFF = params["W1T"].shape[-1]
    H = num_heads
    assert D % H == 0
    Hd = D // H
    scale = float(Hd) ** -0.5

    # Pad context length to a sublane multiple so in-kernel (B*Lp,.) <-> (B,Lp,.) reshapes are
    # tile-aligned; padded positions are masked (attn -> 0) and sliced off below.
    # TODO(synk): production shapes should use D/C/DFF (and ideally L) as multiples of 128 so the
    # score lane axis and every matmul N dim are lane-dense.
    Lp = ((L + 7) // 8) * 8
    if Lp != L:
        context = jnp.pad(context, ((0, 0), (0, Lp - L), (0, 0)))
        context_mask = jnp.pad(context_mask, ((0, 0), (0, Lp - L)))

    # Stat-only context LayerNorm computed ONCE here (per-block affine folded into Wk/Wv below);
    # bf16 cast halves the context's VMEM residency in the kernel.
    ctx = context.astype(jnp.float32)
    mu = jnp.mean(ctx, axis=-1, keepdims=True)
    var = jnp.mean((ctx - mu) ** 2, axis=-1, keepdims=True)
    ctx_n = ((ctx - mu) * jax.lax.rsqrt(var + 1e-5)).astype(jnp.bfloat16).reshape(B * Lp, C)

    # Additive mask precomputed once: 0 where valid, -1e30 where masked.
    # TODO(synk): fully-masked rows are unsupported (torch reference would produce NaN there).
    amask = jnp.where(context_mask, 0.0, -1e30).astype(jnp.float32)

    # Head indicator (transposed): indht[h, d] = 1 iff feature d belongs to head h.
    indht = (jnp.arange(H)[:, None] == (jnp.arange(D) // Hd)[None, :]).astype(jnp.float32)

    # Fold the softmax scale into Wq and the per-block context-norm affine into Wk/Wv:
    #   LN(c; g2, b2) @ W == LN0(c) @ (g2 * W) + b2 @ W
    bf = jnp.bfloat16
    wq = (params["WqT"] * scale).astype(bf)
    g2c = jnp.transpose(params["g2"], (0, 2, 1))                     # (NB, C, 1)
    wk = (params["WkT"] * g2c).astype(bf)
    wv = (params["WvT"] * g2c).astype(bf)
    bk = jnp.einsum("noc,ncd->nod", params["b2"], params["WkT"]).astype(jnp.float32)
    bv = jnp.einsum("noc,ncd->nod", params["b2"], params["WvT"]).astype(jnp.float32)
    wo = params["WoT"].astype(bf)
    w1 = params["W1T"].astype(bf)
    w2 = params["W2T"].astype(bf)
    # TODO(synk): for weight-DMA-bound call sites stream int8 weights (v5e/v6e) or fp8 (v7x) with
    # per-column scales instead of bf16.

    # FFN tiled over DFF chunks (inner grid axis) to cap per-step streamed-weight residency.
    TDFF = ffn_tile if ffn_tile is not None else _pick_ffn_tile(DFF)
    assert DFF % TDFF == 0
    KFF = DFF // TDFF

    # Optional batch split across TensorCores (v7x). Only when per-core batch stays 8-aligned.
    BS = batch_splits if batch_splits is not None else _default_batch_splits(B)
    if B % BS != 0 or (BS > 1 and (B // BS) % 8 != 0):
        BS = 1
    Bh = B // BS

    kernel = functools.partial(_cross_perceiver_kernel, Bh=Bh, Lp=Lp, D=D)

    def fixed(shape):
        n = len(shape)
        return pl.BlockSpec(shape, lambda bi, blk, ff, n=n: (0,) * n)

    def batched(shape):
        n = len(shape)
        return pl.BlockSpec(shape, lambda bi, blk, ff, n=n: (bi,) + (0,) * (n - 1))

    def per_block(tail):
        n = len(tail)
        return pl.BlockSpec((None,) + tail, lambda bi, blk, ff, n=n: (blk,) + (0,) * n)

    grid_spec = pltpu.PrefetchScalarGridSpec(
        num_scalar_prefetch=0,
        grid=(BS, NB, KFF),              # batch-split (parallel) x blocks x FFN chunks
        in_specs=[
            batched((Bh, D)),            # x (latent)
            batched((Bh * Lp, C)),       # context (stat-normalized, bf16, flattened)
            batched((Bh, Lp)),           # additive mask
            fixed((H, D)),               # head indicator (transposed)
            fixed((1, D)), fixed((1, D)),              # output LayerNorm gamma / beta
            per_block((1, D)), per_block((1, D)),      # pre_norm1 gamma / beta
            per_block((1, D)), per_block((1, D)),      # pre_norm3 gamma / beta
            per_block((D, D)),                         # WqT (scale folded)
            per_block((C, D)), per_block((1, D)),      # WkT (g2 folded), bias b2 @ Wk
            per_block((C, D)), per_block((1, D)),      # WvT (g2 folded), bias b2 @ Wv
            per_block((D, D)), per_block((1, D)),      # WoT, to_out bias
            pl.BlockSpec((None, D, TDFF), lambda bi, blk, ff: (blk, 0, ff)),   # W1T chunk
            pl.BlockSpec((None, TDFF, D), lambda bi, blk, ff: (blk, ff, 0)),   # W2T chunk
        ],
        out_specs=(batched((Bh, D)), batched((Bh, Lp))),
        scratch_shapes=[pltpu.VMEM((Bh, D), jnp.bfloat16)],   # pre_norm3(x1) carried over chunks
    )

    x_out, amap = pl.pallas_call(
        kernel,
        out_shape=(jax.ShapeDtypeStruct((B, D), jnp.float32),
                   jax.ShapeDtypeStruct((B, Lp), jnp.float32)),
        grid_spec=grid_spec,
        compiler_params=pltpu.CompilerParams(
            dimension_semantics=("parallel", "arbitrary", "arbitrary"),
            vmem_limit_bytes=_vmem_limit_bytes(),
        ),
    )(x.astype(jnp.float32), ctx_n, amask, indht,
      params["g_out"], params["b_out"],
      params["g1"], params["b1"], params["g3"], params["b3"],
      wq, wk, bk, wv, bv, wo, params["bo"], w1, w2)
    return x_out, amap[:, :L]


# ----------------------------------------------------------------------------------------------
# pure-JAX reference (mirrors the PyTorch module) + deterministic params
# ----------------------------------------------------------------------------------------------
def cross_perceiver_ref(x, context, context_mask, params, *, num_heads):
    B, D = x.shape
    _, L, C = context.shape
    H = num_heads
    Hd = D // H
    scale = float(Hd) ** -0.5

    def ln(v, g, b, eps=1e-5):
        mu = jnp.mean(v, -1, keepdims=True)
        var = jnp.mean((v - mu) ** 2, -1, keepdims=True)
        return (v - mu) / jnp.sqrt(var + eps) * g + b

    xb = x
    amap = jnp.zeros((B, L), jnp.float32)
    NB = params["WqT"].shape[0]
    for n in range(NB):
        xn = ln(xb, params["g1"][n, 0], params["b1"][n, 0])
        cn = ln(context, params["g2"][n, 0], params["b2"][n, 0])
        q = (xn @ params["WqT"][n]).reshape(B, H, Hd)
        k = (cn @ params["WkT"][n]).reshape(B, L, H, Hd)
        v = (cn @ params["WvT"][n]).reshape(B, L, H, Hd)
        s = jnp.einsum("bhf,blhf->bhl", q * scale, k)
        s = jnp.where(context_mask[:, None, :], s, -jnp.inf)
        attn = jax.nn.softmax(s, axis=-1)
        amap = amap + attn.sum(axis=1)
        y = jnp.einsum("bhl,blhf->bhf", attn, v).reshape(B, D)
        x1 = xb + y @ params["WoT"][n] + params["bo"][n, 0]
        h = jax.nn.gelu(ln(x1, params["g3"][n, 0], params["b3"][n, 0]) @ params["W1T"][n],
                        approximate=False)
        xb = x1 + h @ params["W2T"][n]
    return ln(xb, params["g_out"][0], params["b_out"][0]), amap


def init_params(key, D, C, NB, mult=4):
    # Deterministic synthetic parameters (shapes follow the module's __init__).  Linear weights
    # are stored already-transposed (W*T == torch_weight.T); to_kv is split into key / value
    # halves.  LayerNorm gammas/betas are perturbed so the g2/b2 -> Wk/Wv fold is exercised.
    ks = jax.random.split(key, 15)

    def nrm(k, shape, scale=0.02):
        return (scale * jax.random.normal(k, shape)).astype(jnp.float32)

    return dict(
        g1=1.0 + nrm(ks[0], (NB, 1, D), 0.1), b1=nrm(ks[1], (NB, 1, D), 0.1),
        g2=1.0 + nrm(ks[2], (NB, 1, C), 0.1), b2=nrm(ks[3], (NB, 1, C), 0.1),
        g3=1.0 + nrm(ks[4], (NB, 1, D), 0.1), b3=nrm(ks[5], (NB, 1, D), 0.1),
        WqT=nrm(ks[6], (NB, D, D)),            # to_q.weight.T            (bias=False)
        WkT=nrm(ks[7], (NB, C, D)),            # to_kv.weight.T[:, :D]    (keys)
        WvT=nrm(ks[8], (NB, C, D)),            # to_kv.weight.T[:, D:2D]  (values)
        WoT=nrm(ks[9], (NB, D, D)),            # to_out.weight.T
        bo=nrm(ks[10], (NB, 1, D)),            # to_out.bias
        W1T=nrm(ks[11], (NB, D, mult * D)),    # ffn linear 1 (bias=False)
        W2T=nrm(ks[12], (NB, mult * D, D)),    # ffn linear 2 (bias=False)
        g_out=1.0 + nrm(ks[13], (1, D), 0.1), b_out=nrm(ks[14], (1, D), 0.1),
    )


if __name__ == "__main__":
    B, L, D, C, H, NB = 2, 8, 32, 16, 4, 2   # batch, context_len, model_dim, context_dim, heads, blocks
    key = jax.random.PRNGKey(0)
    kx, kc, kp = jax.random.split(key, 3)
    x = jax.random.normal(kx, (B, D), jnp.float32)
    context = jax.random.normal(kc, (B, L, C), jnp.float32)
    lens = jnp.array([L, 5])
    context_mask = jnp.arange(L)[None, :] < lens[:, None]   # (B, L) bool, no fully-masked rows
    params = init_params(kp, D, C, NB)

    x_out, attn_maps = cross_perceiver(x, context, context_mask, params, num_heads=H)
    jax.block_until_ready((x_out, attn_maps))

    assert x_out.shape == (B, D) and attn_maps.shape == (B, L)
    assert jnp.all(jnp.isfinite(x_out)) and jnp.all(jnp.isfinite(attn_maps))

    # Self-check against the pure-JAX f32 reference (kernel uses bf16 matmuls -> loose tolerance).
    x_exp, amap_exp = cross_perceiver_ref(x, context, context_mask, params, num_heads=H)
    assert float(jnp.max(jnp.abs(x_out - x_exp))) < 2e-2
    assert float(jnp.max(jnp.abs(attn_maps - amap_exp))) < 2e-2

    # TODO(synk): attention_dropout is 0.0 in this module path, so dropout is omitted.
    print("KERNEL_OK")
</pallas_src>

<mosaic_0001>
module attributes {stable_mosaic.version = 11 : i64} {
  func.func @_cross_perceiver_kernel(%arg0: i32, %arg1: i32, %arg2: i32, %arg3: memref<2x32xf32, #tpu.memory_space<vmem>>, %arg4: memref<16x16xbf16, #tpu.memory_space<vmem>>, %arg5: memref<2x8xf32, #tpu.memory_space<vmem>>, %arg6: memref<4x32xf32, #tpu.memory_space<vmem>>, %arg7: memref<1x32xf32, #tpu.memory_space<vmem>>, %arg8: memref<1x32xf32, #tpu.memory_space<vmem>>, %arg9: memref<1x1x32xf32, #tpu.memory_space<vmem>>, %arg10: memref<1x1x32xf32, #tpu.memory_space<vmem>>, %arg11: memref<1x1x32xf32, #tpu.memory_space<vmem>>, %arg12: memref<1x1x32xf32, #tpu.memory_space<vmem>>, %arg13: memref<1x32x32xbf16, #tpu.memory_space<vmem>>, %arg14: memref<1x16x32xbf16, #tpu.memory_space<vmem>>, %arg15: memref<1x1x32xf32, #tpu.memory_space<vmem>>, %arg16: memref<1x16x32xbf16, #tpu.memory_space<vmem>>, %arg17: memref<1x1x32xf32, #tpu.memory_space<vmem>>, %arg18: memref<1x32x32xbf16, #tpu.memory_space<vmem>>, %arg19: memref<1x1x32xf32, #tpu.memory_space<vmem>>, %arg20: memref<1x32x128xbf16, #tpu.memory_space<vmem>>, %arg21: memref<1x128x32xbf16, #tpu.memory_space<vmem>>, %arg22: memref<2x32xf32, #tpu.memory_space<vmem>>, %arg23: memref<2x8xf32, #tpu.memory_space<vmem>>, %arg24: memref<2x32xbf16, #tpu.memory_space<vmem>>) attributes {dimension_semantics = [#tpu.dimension_semantics<parallel>, #tpu.dimension_semantics<arbitrary>, #tpu.dimension_semantics<arbitrary>], iteration_bounds = array<i64: 1, 2, 1>, scalar_prefetch = 0 : i64, scratch_operands = 1 : i64, tpu.core_type = #tpu.core_type<tc>, window_params = [{transform_indices = @transform_0, window_bounds = array<i64: 2, 32>}, {transform_indices = @transform_1, window_bounds = array<i64: 16, 16>}, {transform_indices = @transform_2, window_bounds = array<i64: 2, 8>}, {pipeline_mode = #tpu.pipeline_mode<synchronous>, transform_indices = @transform_3, window_bounds = array<i64: 4, 32>}, {pipeline_mode = #tpu.pipeline_mode<synchronous>, transform_indices = @transform_4, window_bounds = array<i64: 1, 32>}, {pipeline_mode = #tpu.pipeline_mode<synchronous>, transform_indices = @transform_5, window_bounds = array<i64: 1, 32>}, {transform_indices = @transform_6, window_bounds = array<i64: 1, 1, 32>}, {transform_indices = @transform_7, window_bounds = array<i64: 1, 1, 32>}, {transform_indices = @transform_8, window_bounds = array<i64: 1, 1, 32>}, {transform_indices = @transform_9, window_bounds = array<i64: 1, 1, 32>}, {transform_indices = @transform_10, window_bounds = array<i64: 1, 32, 32>}, {transform_indices = @transform_11, window_bounds = array<i64: 1, 16, 32>}, {transform_indices = @transform_12, window_bounds = array<i64: 1, 1, 32>}, {transform_indices = @transform_13, window_bounds = array<i64: 1, 16, 32>}, {transform_indices = @transform_14, window_bounds = array<i64: 1, 1, 32>}, {transform_indices = @transform_15, window_bounds = array<i64: 1, 32, 32>}, {transform_indices = @transform_16, window_bounds = array<i64: 1, 1, 32>}, {transform_indices = @transform_17, window_bounds = array<i64: 1, 32, 128>}, {transform_indices = @transform_18, window_bounds = array<i64: 1, 128, 32>}, {transform_indices = @transform_19, window_bounds = array<i64: 2, 32>}, {transform_indices = @transform_20, window_bounds = array<i64: 2, 8>}]} {
    %c0_i32 = arith.constant 0 : i32
    %0 = arith.cmpi eq, %arg1, %c0_i32 : i32
    %c0_i32_0 = arith.constant 0 : i32
    %1 = arith.cmpi eq, %arg2, %c0_i32_0 : i32
    %2 = arith.andi %0, %1 : i1
    %3 = arith.extui %2 : i1 to i32
    %c0_i32_1 = arith.constant 0 : i32
    %4 = arith.cmpi ne, %3, %c0_i32_1 : i32
    scf.if %4 {
      %c0_34 = arith.constant 0 : index
      %c0_35 = arith.constant 0 : index
      %65 = vector.load %arg3[%c0_34, %c0_35] : memref<2x32xf32, #tpu.memory_space<vmem>>, vector<2x32xf32>
      %c0_36 = arith.constant 0 : index
      %c0_37 = arith.constant 0 : index
      %66 = vector.load %arg22[%c0_36, %c0_37] : memref<2x32xf32, #tpu.memory_space<vmem>>, vector<2x32xf32>
      tpu.vector_store %arg22[%c0_36, %c0_37], %65 {strides = array<i32>} : memref<2x32xf32, #tpu.memory_space<vmem>>, vector<2x32xf32>,
      %cst_38 = arith.constant 0.000000e+00 : f32
      %67 = vector.broadcast %cst_38 : f32 to vector<2x8xf32>
      %c0_39 = arith.constant 0 : index
      %c0_40 = arith.constant 0 : index
      %68 = vector.load %arg23[%c0_39, %c0_40] : memref<2x8xf32, #tpu.memory_space<vmem>>, vector<2x8xf32>
      tpu.vector_store %arg23[%c0_39, %c0_40], %67 {strides = array<i32>} : memref<2x8xf32, #tpu.memory_space<vmem>>, vector<2x8xf32>,
    } else {
    }
    %c0_i32_2 = arith.constant 0 : i32
    %5 = arith.cmpi eq, %arg2, %c0_i32_2 : i32
    %6 = arith.extui %5 : i1 to i32
    %c0_i32_3 = arith.constant 0 : i32
    %7 = arith.cmpi ne, %6, %c0_i32_3 : i32
    scf.if %7 {
      %c0_34 = arith.constant 0 : index
      %c0_35 = arith.constant 0 : index
      %65 = vector.load %arg22[%c0_34, %c0_35] : memref<2x32xf32, #tpu.memory_space<vmem>>, vector<2x32xf32>
      %c0_36 = arith.constant 0 : index
      %c0_37 = arith.constant 0 : index
      %c0_38 = arith.constant 0 : index
      %66 = vector.load %arg9[%c0_36, %c0_37, %c0_38] : memref<1x1x32xf32, #tpu.memory_space<vmem>>, vector<1x1x32xf32>
      %67 = vector.shape_cast %66 : vector<1x1x32xf32> to vector<1x32xf32>
      %c0_39 = arith.constant 0 : index
      %c0_40 = arith.constant 0 : index
      %c0_41 = arith.constant 0 : index
      %68 = vector.load %arg10[%c0_39, %c0_40, %c0_41] : memref<1x1x32xf32, #tpu.memory_space<vmem>>, vector<1x1x32xf32>
      %69 = vector.shape_cast %68 : vector<1x1x32xf32> to vector<1x32xf32>
      %cst_42 = arith.constant dense<0.000000e+00> : vector<2xf32>
      %70 = vector.multi_reduction <add>, %65, %cst_42 [1] : vector<2x32xf32> to vector<2xf32>
      %71 = vector.shape_cast %70 : vector<2xf32> to vector<2x1xf32>
      %cst_43 = arith.constant 3.200000e+01 : f32
      %72 = vector.broadcast %cst_43 : f32 to vector<2x1xf32>
      %73 = arith.divf %71, %72 : vector<2x1xf32>
      %74 = vector.broadcast %73 : vector<2x1xf32> to vector<2x32xf32>
      %75 = arith.subf %65, %74 : vector<2x32xf32>
      %76 = arith.mulf %75, %75 : vector<2x32xf32>
      %cst_44 = arith.constant dense<0.000000e+00> : vector<2xf32>
      %77 = vector.multi_reduction <add>, %76, %cst_44 [1] : vector<2x32xf32> to vector<2xf32>
      %78 = vector.shape_cast %77 : vector<2xf32> to vector<2x1xf32>
      %cst_45 = arith.constant 3.200000e+01 : f32
      %79 = vector.broadcast %cst_45 : f32 to vector<2x1xf32>
      %80 = arith.divf %78, %79 : vector<2x1xf32>
      %81 = vector.broadcast %73 : vector<2x1xf32> to vector<2x32xf32>
      %82 = arith.subf %65, %81 : vector<2x32xf32>
      %cst_46 = arith.constant 9.99999974E-6 : f32
      %83 = vector.broadcast %cst_46 : f32 to vector<2x1xf32>
      %84 = arith.addf %80, %83 : vector<2x1xf32>
      %85 = math.rsqrt %84 : vector<2x1xf32>
      %86 = vector.broadcast %85 : vector<2x1xf32> to vector<2x32xf32>
      %87 = arith.mulf %82, %86 : vector<2x32xf32>
      %88 = vector.broadcast %67 : vector<1x32xf32> to vector<2x32xf32>
      %89 = arith.mulf %87, %88 : vector<2x32xf32>
      %90 = vector.broadcast %69 : vector<1x32xf32> to vector<2x32xf32>
      %91 = arith.addf %89, %90 : vector<2x32xf32>
      %92 = arith.truncf %91 : vector<2x32xf32> to vector<2x32xbf16>
      %c0_47 = arith.constant 0 : index
      %c0_48 = arith.constant 0 : index
      %c0_49 = arith.constant 0 : index
      %93 = vector.load %arg13[%c0_47, %c0_48, %c0_49] : memref<1x32x32xbf16, #tpu.memory_space<vmem>>, vector<1x32x32xbf16>
      %94 = vector.shape_cast %93 : vector<1x32x32xbf16> to vector<32x32xbf16>
      %cst_50 = arith.constant dense<0.000000e+00> : vector<2x32xf32>
      %95 = tpu.matmul %92, %94, %cst_50 {dimension_numbers = #tpu.dot_dimension_numbers<[1], [0], [0], [1], [0, 0, 1, 1], [], []>} : vector<2x32xbf16>, vector<32x32xbf16>, vector<2x32xf32> -> vector<2x32xf32>
      %c0_51 = arith.constant 0 : index
      %c0_52 = arith.constant 0 : index
      %96 = vector.load %arg4[%c0_51, %c0_52] : memref<16x16xbf16, #tpu.memory_space<vmem>>, vector<16x16xbf16>
      %c0_53 = arith.constant 0 : index
      %c0_54 = arith.constant 0 : index
      %c0_55 = arith.constant 0 : index
      %97 = vector.load %arg14[%c0_53, %c0_54, %c0_55] : memref<1x16x32xbf16, #tpu.memory_space<vmem>>, vector<1x16x32xbf16>
      %98 = vector.shape_cast %97 : vector<1x16x32xbf16> to vector<16x32xbf16>
      %cst_56 = arith.constant dense<0.000000e+00> : vector<16x32xf32>
      %99 = tpu.matmul %96, %98, %cst_56 {dimension_numbers = #tpu.dot_dimension_numbers<[1], [0], [0], [1], [0, 0, 1, 1], [], []>} : vector<16x16xbf16>, vector<16x32xbf16>, vector<16x32xf32> -> vector<16x32xf32>
      %c0_57 = arith.constant 0 : index
      %c0_58 = arith.constant 0 : index
      %c0_59 = arith.constant 0 : index
      %100 = vector.load %arg15[%c0_57, %c0_58, %c0_59] : memref<1x1x32xf32, #tpu.memory_space<vmem>>, vector<1x1x32xf32>
      %101 = vector.shape_cast %100 : vector<1x1x32xf32> to vector<1x32xf32>
      %102 = vector.broadcast %101 : vector<1x32xf32> to vector<16x32xf32>
      %103 = arith.addf %99, %102 : vector<16x32xf32>
      %104 = arith.truncf %103 : vector<16x32xf32> to vector<16x32xbf16>
      %105 = vector.shape_cast %104 : vector<16x32xbf16> to vector<2x8x32xbf16>
      %c0_60 = arith.constant 0 : index
      %c0_61 = arith.constant 0 : index
      %c0_62 = arith.constant 0 : index
      %106 = vector.load %arg16[%c0_60, %c0_61, %c0_62] : memref<1x16x32xbf16, #tpu.memory_space<vmem>>, vector<1x16x32xbf16>
      %107 = vector.shape_cast %106 : vector<1x16x32xbf16> to vector<16x32xbf16>
      %cst_63 = arith.constant dense<0.000000e+00> : vector<16x32xf32>
      %108 = tpu.matmul %96, %107, %cst_63 {dimension_numbers = #tpu.dot_dimension_numbers<[1], [0], [0], [1], [0, 0, 1, 1], [], []>} : vector<16x16xbf16>, vector<16x32xbf16>, vector<16x32xf32> -> vector<16x32xf32>
      %c0_64 = arith.constant 0 : index
      %c0_65 = arith.constant 0 : index
      %c0_66 = arith.constant 0 : index
      %109 = vector.load %arg17[%c0_64, %c0_65, %c0_66] : memref<1x1x32xf32, #tpu.memory_space<vmem>>, vector<1x1x32xf32>
      %110 = vector.shape_cast %109 : vector<1x1x32xf32> to vector<1x32xf32>
      %111 = vector.broadcast %110 : vector<1x32xf32> to vector<16x32xf32>
      %112 = arith.addf %108, %111 : vector<16x32xf32>
      %113 = arith.truncf %112 : vector<16x32xf32> to vector<16x32xbf16>
      %114 = vector.shape_cast %113 : vector<16x32xbf16> to vector<2x8x32xbf16>
      %c0_67 = arith.constant 0 : index
      %c0_68 = arith.constant 0 : index
      %115 = vector.load %arg6[%c0_67, %c0_68] : memref<4x32xf32, #tpu.memory_space<vmem>>, vector<4x32xf32>
      %116 = vector.shape_cast %95 : vector<2x32xf32> to vector<2x1x32xf32>
      %117 = vector.shape_cast %115 : vector<4x32xf32> to vector<1x4x32xf32>
      %118 = vector.broadcast %116 : vector<2x1x32xf32> to vector<2x4x32xf32>
      %119 = vector.broadcast %117 : vector<1x4x32xf32> to vector<2x4x32xf32>
      %120 = arith.mulf %118, %119 : vector<2x4x32xf32>
      %121 = arith.truncf %120 : vector<2x4x32xf32> to vector<2x4x32xbf16>
      "tpu.trace_start"() <{level = 10 : i32, message = "bhd,bld->bhl"}> : () -> ()
      %cst_69 = arith.constant dense<0.000000e+00> : vector<2x4x8xf32>
      %122 = tpu.matmul %121, %105, %cst_69 {dimension_numbers = #tpu.dot_dimension_numbers<[2], [2], [1], [1], [0, 0, 0, 1, 1, 1], [0], [0]>} : vector<2x4x32xbf16>, vector<2x8x32xbf16>, vector<2x4x8xf32> -> vector<2x4x8xf32>
      "tpu.trace_stop"() : () -> ()
      %c0_70 = arith.constant 0 : index
      %c0_71 = arith.constant 0 : index
      %123 = vector.load %arg5[%c0_70, %c0_71] : memref<2x8xf32, #tpu.memory_space<vmem>>, vector<2x8xf32>
      %124 = vector.shape_cast %123 : vector<2x8xf32> to vector<2x1x8xf32>
      %125 = vector.broadcast %124 : vector<2x1x8xf32> to vector<2x4x8xf32>
      %126 = arith.addf %122, %125 : vector<2x4x8xf32>
      %cst_72 = arith.constant dense<0xFF800000> : vector<2x4xf32>
      %127 = vector.multi_reduction <maximumf>, %126, %cst_72 [2] : vector<2x4x8xf32> to vector<2x4xf32>
      %128 = vector.shape_cast %127 : vector<2x4xf32> to vector<2x4x1xf32>
      %129 = vector.broadcast %128 : vector<2x4x1xf32> to vector<2x4x8xf32>
      %130 = arith.subf %126, %129 : vector<2x4x8xf32>
      %131 = math.exp %130 : vector<2x4x8xf32>
      %cst_73 = arith.constant dense<0.000000e+00> : vector<2x4xf32>
      %132 = vector.multi_reduction <add>, %131, %cst_73 [2] : vector<2x4x8xf32> to vector<2x4xf32>
      %133 = vector.shape_cast %132 : vector<2x4xf32> to vector<2x4x1xf32>
      %134 = tpu.reciprocal %133 {approx = true} : vector<2x4x1xf32> -> vector<2x4x1xf32>
      %135 = vector.broadcast %134 : vector<2x4x1xf32> to vector<2x4x8xf32>
      %136 = arith.mulf %131, %135 : vector<2x4x8xf32>
      %c0_74 = arith.constant 0 : index
      %c0_75 = arith.constant 0 : index
      %137 = vector.load %arg23[%c0_74, %c0_75] : memref<2x8xf32, #tpu.memory_space<vmem>>, vector<2x8xf32>
      %cst_76 = arith.constant dense<0.000000e+00> : vector<2x8xf32>
      %138 = vector.multi_reduction <add>, %136, %cst_76 [1] : vector<2x4x8xf32> to vector<2x8xf32>
      %139 = arith.addf %137, %138 : vector<2x8xf32>
      %c0_77 = arith.constant 0 : index
      %c0_78 = arith.constant 0 : index
      %140 = vector.load %arg23[%c0_77, %c0_78] : memref<2x8xf32, #tpu.memory_space<vmem>>, vector<2x8xf32>
      tpu.vector_store %arg23[%c0_77, %c0_78], %139 {strides = array<i32>} : memref<2x8xf32, #tpu.memory_space<vmem>>, vector<2x8xf32>,
      %141 = arith.truncf %136 : vector<2x4x8xf32> to vector<2x4x8xbf16>
      "tpu.trace_start"() <{level = 10 : i32, message = "bhl,bld->bhd"}> : () -> ()
      %cst_79 = arith.constant dense<0.000000e+00> : vector<2x4x32xf32>
      %142 = tpu.matmul %141, %114, %cst_79 {dimension_numbers = #tpu.dot_dimension_numbers<[2], [1], [1], [2], [0, 0, 0, 1, 1, 2], [0], [0]>} : vector<2x4x8xbf16>, vector<2x8x32xbf16>, vector<2x4x32xf32> -> vector<2x4x32xf32>
      "tpu.trace_stop"() : () -> ()
      %143 = vector.shape_cast %115 : vector<4x32xf32> to vector<1x4x32xf32>
      %144 = vector.broadcast %143 : vector<1x4x32xf32> to vector<2x4x32xf32>
      %145 = arith.mulf %142, %144 : vector<2x4x32xf32>
      %cst_80 = arith.constant dense<0.000000e+00> : vector<2x32xf32>
      %146 = vector.multi_reduction <add>, %145, %cst_80 [1] : vector<2x4x32xf32> to vector<2x32xf32>
      %147 = arith.truncf %146 : vector<2x32xf32> to vector<2x32xbf16>
      %c0_81 = arith.constant 0 : index
      %c0_82 = arith.constant 0 : index
      %c0_83 = arith.constant 0 : index
      %148 = vector.load %arg18[%c0_81, %c0_82, %c0_83] : memref<1x32x32xbf16, #tpu.memory_space<vmem>>, vector<1x32x32xbf16>
      %149 = vector.shape_cast %148 : vector<1x32x32xbf16> to vector<32x32xbf16>
      %cst_84 = arith.constant dense<0.000000e+00> : vector<2x32xf32>
      %150 = tpu.matmul %147, %149, %cst_84 {dimension_numbers = #tpu.dot_dimension_numbers<[1], [0], [0], [1], [0, 0, 1, 1], [], []>} : vector<2x32xbf16>, vector<32x32xbf16>, vector<2x32xf32> -> vector<2x32xf32>
      %c0_85 = arith.constant 0 : index
      %c0_86 = arith.constant 0 : index
      %c0_87 = arith.constant 0 : index
      %151 = vector.load %arg19[%c0_85, %c0_86, %c0_87] : memref<1x1x32xf32, #tpu.memory_space<vmem>>, vector<1x1x32xf32>
      %152 = vector.shape_cast %151 : vector<1x1x32xf32> to vector<1x32xf32>
      %153 = vector.broadcast %152 : vector<1x32xf32> to vector<2x32xf32>
      %154 = arith.addf %150, %153 : vector<2x32xf32>
      %155 = arith.addf %65, %154 : vector<2x32xf32>
      %c0_88 = arith.constant 0 : index
      %c0_89 = arith.constant 0 : index
      %156 = vector.load %arg22[%c0_88, %c0_89] : memref<2x32xf32, #tpu.memory_space<vmem>>, vector<2x32xf32>
      tpu.vector_store %arg22[%c0_88, %c0_89], %155 {strides = array<i32>} : memref<2x32xf32, #tpu.memory_space<vmem>>, vector<2x32xf32>,
      %c0_90 = arith.constant 0 : index
      %c0_91 = arith.constant 0 : index
      %c0_92 = arith.constant 0 : index
      %157 = vector.load %arg11[%c0_90, %c0_91, %c0_92] : memref<1x1x32xf32, #tpu.memory_space<vmem>>, vector<1x1x32xf32>
      %158 = vector.shape_cast %157 : vector<1x1x32xf32> to vector<1x32xf32>
      %c0_93 = arith.constant 0 : index
      %c0_94 = arith.constant 0 : index
      %c0_95 = arith.constant 0 : index
      %159 = vector.load %arg12[%c0_93, %c0_94, %c0_95] : memref<1x1x32xf32, #tpu.memory_space<vmem>>, vector<1x1x32xf32>
      %160 = vector.shape_cast %159 : vector<1x1x32xf32> to vector<1x32xf32>
      %cst_96 = arith.constant dense<0.000000e+00> : vector<2xf32>
      %161 = vector.multi_reduction <add>, %155, %cst_96 [1] : vector<2x32xf32> to vector<2xf32>
      %162 = vector.shape_cast %161 : vector<2xf32> to vector<2x1xf32>
      %cst_97 = arith.constant 3.200000e+01 : f32
      %163 = vector.broadcast %cst_97 : f32 to vector<2x1xf32>
      %164 = arith.divf %162, %163 : vector<2x1xf32>
      %165 = vector.broadcast %164 : vector<2x1xf32> to vector<2x32xf32>
      %166 = arith.subf %155, %165 : vector<2x32xf32>
      %167 = arith.mulf %166, %166 : vector<2x32xf32>
      %cst_98 = arith.constant dense<0.000000e+00> : vector<2xf32>
      %168 = vector.multi_reduction <add>, %167, %cst_98 [1] : vector<2x32xf32> to vector<2xf32>
      %169 = vector.shape_cast %168 : vector<2xf32> to vector<2x1xf32>
      %cst_99 = arith.constant 3.200000e+01 : f32
      %170 = vector.broadcast %cst_99 : f32 to vector<2x1xf32>
      %171 = arith.divf %169, %170 : vector<2x1xf32>
      %172 = vector.broadcast %164 : vector<2x1xf32> to vector<2x32xf32>
      %173 = arith.subf %155, %172 : vector<2x32xf32>
      %cst_100 = arith.constant 9.99999974E-6 : f32
      %174 = vector.broadcast %cst_100 : f32 to vector<2x1xf32>
      %175 = arith.addf %171, %174 : vector<2x1xf32>
      %176 = math.rsqrt %175 : vector<2x1xf32>
      %177 = vector.broadcast %176 : vector<2x1xf32> to vector<2x32xf32>
      %178 = arith.mulf %173, %177 : vector<2x32xf32>
      %179 = vector.broadcast %158 : vector<1x32xf32> to vector<2x32xf32>
      %180 = arith.mulf %178, %179 : vector<2x32xf32>
      %181 = vector.broadcast %160 : vector<1x32xf32> to vector<2x32xf32>
      %182 = arith.addf %180, %181 : vector<2x32xf32>
      %183 = arith.truncf %182 : vector<2x32xf32> to vector<2x32xbf16>
      %c0_101 = arith.constant 0 : index
      %c0_102 = arith.constant 0 : index
      %184 = vector.load %arg24[%c0_101, %c0_102] : memref<2x32xbf16, #tpu.memory_space<vmem>>, vector<2x32xbf16>
      tpu.vector_store %arg24[%c0_101, %c0_102], %183 {strides = array<i32>} : memref<2x32xbf16, #tpu.memory_space<vmem>>, vector<2x32xbf16>,
    } else {
    }
    %c0 = arith.constant 0 : index
    %c0_4 = arith.constant 0 : index
    %8 = vector.load %arg24[%c0, %c0_4] : memref<2x32xbf16, #tpu.memory_space<vmem>>, vector<2x32xbf16>
    %c0_5 = arith.constant 0 : index
    %c0_6 = arith.constant 0 : index
    %c0_7 = arith.constant 0 : index
    %9 = vector.load %arg20[%c0_5, %c0_6, %c0_7] : memref<1x32x128xbf16, #tpu.memory_space<vmem>>, vector<1x32x128xbf16>
    %10 = vector.shape_cast %9 : vector<1x32x128xbf16> to vector<32x128xbf16>
    %cst = arith.constant dense<0.000000e+00> : vector<2x128xf32>
    %11 = tpu.matmul %8, %10, %cst {dimension_numbers = #tpu.dot_dimension_numbers<[1], [0], [0], [1], [0, 0, 1, 1], [], []>} : vector<2x32xbf16>, vector<32x128xbf16>, vector<2x128xf32> -> vector<2x128xf32>
    %cst_8 = arith.constant 5.000000e-01 : f32
    %12 = vector.broadcast %cst_8 : f32 to vector<2x128xf32>
    %13 = arith.mulf %12, %11 : vector<2x128xf32>
    %cst_9 = arith.constant 0.707106769 : f32
    %14 = vector.broadcast %cst_9 : f32 to vector<2x128xf32>
    %15 = arith.mulf %11, %14 : vector<2x128xf32>
    %cst_10 = arith.constant 0.000000e+00 : f32
    %16 = vector.broadcast %cst_10 : f32 to vector<2x128xf32>
    %17 = arith.cmpf oge, %15, %16 : vector<2x128xf32>
    %cst_11 = arith.constant 1.000000e+00 : f32
    %cst_12 = arith.constant -1.000000e+00 : f32
    %18 = vector.broadcast %cst_11 : f32 to vector<2x128xf32>
    %19 = vector.broadcast %cst_12 : f32 to vector<2x128xf32>
    %20 = arith.select %17, %18, %19 : vector<2x128xi1>, vector<2x128xf32>
    %21 = math.absf %15 : vector<2x128xf32>
    %cst_13 = arith.constant 0.327591091 : f32
    %22 = vector.broadcast %cst_13 : f32 to vector<2x128xf32>
    %23 = arith.mulf %22, %21 : vector<2x128xf32>
    %cst_14 = arith.constant 1.000000e+00 : f32
    %24 = vector.broadcast %cst_14 : f32 to vector<2x128xf32>
    %25 = arith.addf %24, %23 : vector<2x128xf32>
    %cst_15 = arith.constant 1.000000e+00 : f32
    %26 = vector.broadcast %cst_15 : f32 to vector<2x128xf32>
    %27 = arith.divf %26, %25 : vector<2x128xf32>
    %cst_16 = arith.constant 1.06140542 : f32
    %28 = vector.broadcast %cst_16 : f32 to vector<2x128xf32>
    %29 = arith.mulf %28, %27 : vector<2x128xf32>
    %cst_17 = arith.constant -1.45315206 : f32
    %30 = vector.broadcast %cst_17 : f32 to vector<2x128xf32>
    %31 = arith.addf %29, %30 : vector<2x128xf32>
    %32 = arith.mulf %31, %27 : vector<2x128xf32>
    %cst_18 = arith.constant 1.42141378 : f32
    %33 = vector.broadcast %cst_18 : f32 to vector<2x128xf32>
    %34 = arith.addf %32, %33 : vector<2x128xf32>
    %35 = arith.mulf %34, %27 : vector<2x128xf32>
    %cst_19 = arith.constant -0.284496725 : f32
    %36 = vector.broadcast %cst_19 : f32 to vector<2x128xf32>
    %37 = arith.addf %35, %36 : vector<2x128xf32>
    %38 = arith.mulf %37, %27 : vector<2x128xf32>
    %cst_20 = arith.constant 0.254829586 : f32
    %39 = vector.broadcast %cst_20 : f32 to vector<2x128xf32>
    %40 = arith.addf %38, %39 : vector<2x128xf32>
    %41 = arith.mulf %40, %27 : vector<2x128xf32>
    %cst_21 = arith.constant 0.000000e+00 : f32
    %42 = vector.broadcast %cst_21 : f32 to vector<2x128xf32>
    %43 = arith.subf %42, %21 : vector<2x128xf32>
    %44 = arith.mulf %43, %21 : vector<2x128xf32>
    %45 = math.exp %44 : vector<2x128xf32>
    %46 = arith.mulf %41, %45 : vector<2x128xf32>
    %cst_22 = arith.constant 1.000000e+00 : f32
    %47 = vector.broadcast %cst_22 : f32 to vector<2x128xf32>
    %48 = arith.subf %47, %46 : vector<2x128xf32>
    %49 = arith.mulf %20, %48 : vector<2x128xf32>
    %cst_23 = arith.constant 1.000000e+00 : f32
    %50 = vector.broadcast %cst_23 : f32 to vector<2x128xf32>
    %51 = arith.addf %50, %49 : vector<2x128xf32>
    %52 = arith.mulf %13, %51 : vector<2x128xf32>
    %c0_24 = arith.constant 0 : index
    %c0_25 = arith.constant 0 : index
    %53 = vector.load %arg22[%c0_24, %c0_25] : memref<2x32xf32, #tpu.memory_space<vmem>>, vector<2x32xf32>
    %54 = arith.truncf %52 : vector<2x128xf32> to vector<2x128xbf16>
    %c0_26 = arith.constant 0 : index
    %c0_27 = arith.constant 0 : index
    %c0_28 = arith.constant 0 : index
    %55 = vector.load %arg21[%c0_26, %c0_27, %c0_28] : memref<1x128x32xbf16, #tpu.memory_space<vmem>>, vector<1x128x32xbf16>
    %56 = vector.shape_cast %55 : vector<1x128x32xbf16> to vector<128x32xbf16>
    %cst_29 = arith.constant dense<0.000000e+00> : vector<2x32xf32>
    %57 = tpu.matmul %54, %56, %cst_29 {dimension_numbers = #tpu.dot_dimension_numbers<[1], [0], [0], [1], [0, 0, 1, 1], [], []>} : vector<2x128xbf16>, vector<128x32xbf16>, vector<2x32xf32> -> vector<2x32xf32>
    %58 = arith.addf %53, %57 : vector<2x32xf32>
    %c0_30 = arith.constant 0 : index
    %c0_31 = arith.constant 0 : index
    %59 = vector.load %arg22[%c0_30, %c0_31] : memref<2x32xf32, #tpu.memory_space<vmem>>, vector<2x32xf32>
    tpu.vector_store %arg22[%c0_30, %c0_31], %58 {strides = array<i32>} : memref<2x32xf32, #tpu.memory_space<vmem>>, vector<2x32xf32>,
    %c1_i32 = arith.constant 1 : i32
    %60 = arith.cmpi eq, %arg1, %c1_i32 : i32
    %c0_i32_32 = arith.constant 0 : i32
    %61 = arith.cmpi eq, %arg2, %c0_i32_32 : i32
    %62 = arith.andi %60, %61 : i1
    %63 = arith.extui %62 : i1 to i32
    %c0_i32_33 = arith.constant 0 : i32
    %64 = arith.cmpi ne, %63, %c0_i32_33 : i32
    scf.if %64 {
      %c0_34 = arith.constant 0 : index
      %c0_35 = arith.constant 0 : index
      %65 = vector.load %arg22[%c0_34, %c0_35] : memref<2x32xf32, #tpu.memory_space<vmem>>, vector<2x32xf32>
      %c0_36 = arith.constant 0 : index
      %c0_37 = arith.constant 0 : index
      %66 = vector.load %arg7[%c0_36, %c0_37] : memref<1x32xf32, #tpu.memory_space<vmem>>, vector<1x32xf32>
      %c0_38 = arith.constant 0 : index
      %c0_39 = arith.constant 0 : index
      %67 = vector.load %arg8[%c0_38, %c0_39] : memref<1x32xf32, #tpu.memory_space<vmem>>, vector<1x32xf32>
      %cst_40 = arith.constant dense<0.000000e+00> : vector<2xf32>
      %68 = vector.multi_reduction <add>, %65, %cst_40 [1] : vector<2x32xf32> to vector<2xf32>
      %69 = vector.shape_cast %68 : vector<2xf32> to vector<2x1xf32>
      %cst_41 = arith.constant 3.200000e+01 : f32
      %70 = vector.broadcast %cst_41 : f32 to vector<2x1xf32>
      %71 = arith.divf %69, %70 : vector<2x1xf32>
      %72 = vector.broadcast %71 : vector<2x1xf32> to vector<2x32xf32>
      %73 = arith.subf %65, %72 : vector<2x32xf32>
      %74 = arith.mulf %73, %73 : vector<2x32xf32>
      %cst_42 = arith.constant dense<0.000000e+00> : vector<2xf32>
      %75 = vector.multi_reduction <add>, %74, %cst_42 [1] : vector<2x32xf32> to vector<2xf32>
      %76 = vector.shape_cast %75 : vector<2xf32> to vector<2x1xf32>
      %cst_43 = arith.constant 3.200000e+01 : f32
      %77 = vector.broadcast %cst_43 : f32 to vector<2x1xf32>
      %78 = arith.divf %76, %77 : vector<2x1xf32>
      %79 = vector.broadcast %71 : vector<2x1xf32> to vector<2x32xf32>
      %80 = arith.subf %65, %79 : vector<2x32xf32>
      %cst_44 = arith.constant 9.99999974E-6 : f32
      %81 = vector.broadcast %cst_44 : f32 to vector<2x1xf32>
      %82 = arith.addf %78, %81 : vector<2x1xf32>
      %83 = math.rsqrt %82 : vector<2x1xf32>
      %84 = vector.broadcast %83 : vector<2x1xf32> to vector<2x32xf32>
      %85 = arith.mulf %80, %84 : vector<2x32xf32>
      %86 = vector.broadcast %66 : vector<1x32xf32> to vector<2x32xf32>
      %87 = arith.mulf %85, %86 : vector<2x32xf32>
      %88 = vector.broadcast %67 : vector<1x32xf32> to vector<2x32xf32>
      %89 = arith.addf %87, %88 : vector<2x32xf32>
      %c0_45 = arith.constant 0 : index
      %c0_46 = arith.constant 0 : index
      %90 = vector.load %arg22[%c0_45, %c0_46] : memref<2x32xf32, #tpu.memory_space<vmem>>, vector<2x32xf32>
      tpu.vector_store %arg22[%c0_45, %c0_46], %89 {strides = array<i32>} : memref<2x32xf32, #tpu.memory_space<vmem>>, vector<2x32xf32>,
    } else {
    }
    return
  }
  func.func @transform_0(%arg0: i32, %arg1: i32, %arg2: i32) -> (i32, i32) {
    %c0_i32 = arith.constant 0 : i32
    %c0_i32_0 = arith.constant 0 : i32
    return %arg0, %c0_i32 : i32, i32
  }
  func.func @transform_1(%arg0: i32, %arg1: i32, %arg2: i32) -> (i32, i32) {
    %c0_i32 = arith.constant 0 : i32
    %c0_i32_0 = arith.constant 0 : i32
    return %arg0, %c0_i32 : i32, i32
  }
  func.func @transform_2(%arg0: i32, %arg1: i32, %arg2: i32) -> (i32, i32) {
    %c0_i32 = arith.constant 0 : i32
    %c0_i32_0 = arith.constant 0 : i32
    return %arg0, %c0_i32 : i32, i32
  }
  func.func @transform_3(%arg0: i32, %arg1: i32, %arg2: i32) -> (i32, i32) {
    %c0_i32 = arith.constant 0 : i32
    %c0_i32_0 = arith.constant 0 : i32
    %c0_i32_1 = arith.constant 0 : i32
    return %c0_i32, %c0_i32_0 : i32, i32
  }
  func.func @transform_4(%arg0: i32, %arg1: i32, %arg2: i32) -> (i32, i32) {
    %c0_i32 = arith.constant 0 : i32
    %c0_i32_0 = arith.constant 0 : i32
    %c0_i32_1 = arith.constant 0 : i32
    return %c0_i32, %c0_i32_0 : i32, i32
  }
  func.func @transform_5(%arg0: i32, %arg1: i32, %arg2: i32) -> (i32, i32) {
    %c0_i32 = arith.constant 0 : i32
    %c0_i32_0 = arith.constant 0 : i32
    %c0_i32_1 = arith.constant 0 : i32
    return %c0_i32, %c0_i32_0 : i32, i32
  }
  func.func @transform_6(%arg0: i32, %arg1: i32, %arg2: i32) -> (i32, i32, i32) {
    %c0_i32 = arith.constant 0 : i32
    %c0_i32_0 = arith.constant 0 : i32
    %c0_i32_1 = arith.constant 0 : i32
    return %arg1, %c0_i32, %c0_i32_0 : i32, i32, i32
  }
  func.func @transform_7(%arg0: i32, %arg1: i32, %arg2: i32) -> (i32, i32, i32) {
    %c0_i32 = arith.constant 0 : i32
    %c0_i32_0 = arith.constant 0 : i32
    %c0_i32_1 = arith.constant 0 : i32
    return %arg1, %c0_i32, %c0_i32_0 : i32, i32, i32
  }
  func.func @transform_8(%arg0: i32, %arg1: i32, %arg2: i32) -> (i32, i32, i32) {
    %c0_i32 = arith.constant 0 : i32
    %c0_i32_0 = arith.constant 0 : i32
    %c0_i32_1 = arith.constant 0 : i32
    return %arg1, %c0_i32, %c0_i32_0 : i32, i32, i32
  }
  func.func @transform_9(%arg0: i32, %arg1: i32, %arg2: i32) -> (i32, i32, i32) {
    %c0_i32 = arith.constant 0 : i32
    %c0_i32_0 = arith.constant 0 : i32
    %c0_i32_1 = arith.constant 0 : i32
    return %arg1, %c0_i32, %c0_i32_0 : i32, i32, i32
  }
  func.func @transform_10(%arg0: i32, %arg1: i32, %arg2: i32) -> (i32, i32, i32) {
    %c0_i32 = arith.constant 0 : i32
    %c0_i32_0 = arith.constant 0 : i32
    %c0_i32_1 = arith.constant 0 : i32
    return %arg1, %c0_i32, %c0_i32_0 : i32, i32, i32
  }
  func.func @transform_11(%arg0: i32, %arg1: i32, %arg2: i32) -> (i32, i32, i32) {
    %c0_i32 = arith.constant 0 : i32
    %c0_i32_0 = arith.constant 0 : i32
    %c0_i32_1 = arith.constant 0 : i32
    return %arg1, %c0_i32, %c0_i32_0 : i32, i32, i32
  }
  func.func @transform_12(%arg0: i32, %arg1: i32, %arg2: i32) -> (i32, i32, i32) {
    %c0_i32 = arith.constant 0 : i32
    %c0_i32_0 = arith.constant 0 : i32
    %c0_i32_1 = arith.constant 0 : i32
    return %arg1, %c0_i32, %c0_i32_0 : i32, i32, i32
  }
  func.func @transform_13(%arg0: i32, %arg1: i32, %arg2: i32) -> (i32, i32, i32) {
    %c0_i32 = arith.constant 0 : i32
    %c0_i32_0 = arith.constant 0 : i32
    %c0_i32_1 = arith.constant 0 : i32
    return %arg1, %c0_i32, %c0_i32_0 : i32, i32, i32
  }
  func.func @transform_14(%arg0: i32, %arg1: i32, %arg2: i32) -> (i32, i32, i32) {
    %c0_i32 = arith.constant 0 : i32
    %c0_i32_0 = arith.constant 0 : i32
    %c0_i32_1 = arith.constant 0 : i32
    return %arg1, %c0_i32, %c0_i32_0 : i32, i32, i32
  }
  func.func @transform_15(%arg0: i32, %arg1: i32, %arg2: i32) -> (i32, i32, i32) {
    %c0_i32 = arith.constant 0 : i32
    %c0_i32_0 = arith.constant 0 : i32
    %c0_i32_1 = arith.constant 0 : i32
    return %arg1, %c0_i32, %c0_i32_0 : i32, i32, i32
  }
  func.func @transform_16(%arg0: i32, %arg1: i32, %arg2: i32) -> (i32, i32, i32) {
    %c0_i32 = arith.constant 0 : i32
    %c0_i32_0 = arith.constant 0 : i32
    %c0_i32_1 = arith.constant 0 : i32
    return %arg1, %c0_i32, %c0_i32_0 : i32, i32, i32
  }
  func.func @transform_17(%arg0: i32, %arg1: i32, %arg2: i32) -> (i32, i32, i32) {
    %c0_i32 = arith.constant 0 : i32
    %c0_i32_0 = arith.constant 0 : i32
    return %arg1, %c0_i32, %arg2 : i32, i32, i32
  }
  func.func @transform_18(%arg0: i32, %arg1: i32, %arg2: i32) -> (i32, i32, i32) {
    %c0_i32 = arith.constant 0 : i32
    %c0_i32_0 = arith.constant 0 : i32
    return %arg1, %arg2, %c0_i32 : i32, i32, i32
  }
  func.func @transform_19(%arg0: i32, %arg1: i32, %arg2: i32) -> (i32, i32) {
    %c0_i32 = arith.constant 0 : i32
    %c0_i32_0 = arith.constant 0 : i32
    return %arg0, %c0_i32 : i32, i32
  }
  func.func @transform_20(%arg0: i32, %arg1: i32, %arg2: i32) -> (i32, i32) {
    %c0_i32 = arith.constant 0 : i32
    %c0_i32_0 = arith.constant 0 : i32
    return %arg0, %c0_i32 : i32, i32
  }
}

</mosaic_0001>

<bundles_post_ra>
// kernel: tpu_custom_call.1
= control target key start
LH: loop header
LB: loop body
LE: loop exit
PB: predicated region body
PF: predicated region fallthrough
CT: control target
= control target key end

     0   :  { %s2864_s0 = inlined_call_operand.vmem [shape: f32[2,32], index: 0, kind: input, shape index: {}]   ;;  %s2865_s1 = inlined_call_operand.vmem [shape: bf16[16,16], index: 1, kind: input, shape index: {}]   ;;  %s2866_s2 = inlined_call_operand.vmem [shape: f32[2,8], index: 2, kind: input, shape index: {}]   ;;  %s2867_s3 = inlined_call_operand.vmem [shape: f32[4,32], index: 3, kind: input, shape index: {}]   ;;  %s2868_s4 = inlined_call_operand.vmem [shape: f32[1,32], index: 4, kind: input, shape index: {}]   ;;  %s2869_s5 = inlined_call_operand.vmem [shape: f32[1,32], index: 5, kind: input, shape index: {}]   ;;  %s2870_s6 = inlined_call_operand.vmem [shape: f32[2,1,32], index: 6, kind: input, shape index: {}]   ;;  %s2871_s7 = inlined_call_operand.vmem [shape: f32[2,1,32], index: 7, kind: input, shape index: {}]   ;;  %s2872_s8 = inlined_call_operand.vmem [shape: f32[2,1,32], index: 8, kind: input, shape index: {}]   ;;  %s2873_s9 = inlined_call_operand.vmem [shape: f32[2,1,32], index: 9, kind: input, shape index: {}]   ;;  %s2874_s10 = inlined_call_operand.vmem [shape: bf16[2,32,32], index: 10, kind: input, shape index: {}]   ;;  %s2875_s11 = inlined_call_operand.vmem [shape: bf16[2,16,32], index: 11, kind: input, shape index: {}]   ;;  %s2876_s12 = inlined_call_operand.vmem [shape: f32[2,1,32], index: 12, kind: input, shape index: {}]   ;;  %s2877_s13 = inlined_call_operand.vmem [shape: bf16[2,16,32], index: 13, kind: input, shape index: {}]   ;;  %s2878_s14 = inlined_call_operand.vmem [shape: f32[2,1,32], index: 14, kind: input, shape index: {}]   ;;  %s2879_s15 = inlined_call_operand.vmem [shape: bf16[2,32,32], index: 15, kind: input, shape index: {}]   ;;  %s2880_s16 = inlined_call_operand.vmem [shape: f32[2,1,32], index: 16, kind: input, shape index: {}]   ;;  %s2881_s17 = inlined_call_operand.vmem [shape: bf16[2,32,128], index: 17, kind: input, shape index: {}]   ;;  %s2882_s18 = inlined_call_operand.vmem [shape: bf16[2,128,32], index: 18, kind: input, shape index: {}]   ;;  %s2883_s19 = inlined_call_operand.hbm [shape: f32[2,32], index: 19, kind: output, shape index: {0}]   ;;  %s2884_s20 = inlined_call_operand.hbm [shape: f32[2,8], index: 20, kind: output, shape index: {1}]  }
   0x1   :  { %2889 = sst [smem:[#allocation12_spill]] %s2864_s0 }
   0x2   :  { %2890 = sst [smem:[#allocation13_spill]] %s2865_s1 }
   0x3   :  { %2891 = sst [smem:[#allocation14_spill]] %s2866_s2 }
   0x4   :  { %2892 = sst [smem:[#allocation15_spill]] %s2867_s3 }
   0x5   :  { %2893 = sst [smem:[#allocation16_spill]] %s2868_s4 }
   0x6   :  { %2894 = sst [smem:[#allocation17_spill]] %s2869_s5 }
   0x7   :  { %2895 = sst [smem:[#allocation18_spill]] %s2873_s9 }
   0x8   :  { %2896 = sst [smem:[#allocation19_spill]] %s2874_s10 }
   0x9   :  { %2897 = sst [smem:[#allocation20_spill]] %s2875_s11 }
   0xa   :  { %2898 = sst [smem:[#allocation21_spill]] %s2883_s19 }
   0xb   :  { %2899 = sst [smem:[#allocation22_spill]] %s2884_s20 }
   0xc   :  { %26 = vsyncpa [#allocation4], 0 }
   0xd   :  { %27 = vsyncpa [#allocation6], 0  ;;  %s2564_s1 = smov 0   ;;  %s2566_s22 = smov 0  }
   0xe   :  { %s2568_s23 = smov 0  }
   0xf LB: > { %2900 = sst [smem:[#allocation9_spill]] %s2446_s22  ;;  %s48_s2 = sadd.s32 1, %s2446_s22  ;;  %s2450_s23 = sphi %s2568_s23, %s33_s23   ;;  %s2446_s22 = sphi %s2566_s22, %s2925_s22   ;;  %s2442_s1 = sphi %s2564_s1, %s2924_s1  }
  0x10   : > { %2901 = sst [smem:[#allocation10_spill]] %s2450_s23  ;;  %p50_p0 = scmp.ge.s32.totalorder %s48_s2, 2 }
  0x11   : > { %p2107_p1 = scmp.ge.s32.totalorder %s2450_s23, 1  ;;  %p733_p2 = scmp.lt.s32.totalorder %s2450_s23, 3 }
  0x12   : > { %s2927_s2 = smov (%p50_p0, %s48_s2), 0 }
  0x13   : > { %2902 = sst [smem:[#allocation11_spill]] %s2927_s2  ;;  %p734_p3 = pnand %p2107_p1, %p733_p2 }
  0x14   : > { %p866_p4 = scmp.lt.s32.totalorder (!%p734_p3), %s2442_s1, 1  ;;  %p926_p5 = scmp.eq.s32.totalorder (!%p734_p3), %s2442_s1, 0 }
  0x15   : > { %737 = sbr.rel (%p734_p3) target bundleno = 2759 (0xac7), region = 96  ;;  %s2904_s10 = sld [smem:[#allocation19_spill]] (!%p734_p3) }
  0x16   : > { %s2905_s11 = sld [smem:[#allocation20_spill]] (!%p734_p3) }
  0x1c   : > { %s2588_s25 = scalar_select %p866_p4, %s2442_s1, 1 }
  0x1d   : > { %931 = sbr.rel (!%p926_p5) target bundleno = 37 (0x25), region = 100  ;;  %s2906_s20 = sld [smem:[#allocation12_spill]] (%p926_p5)  ;;  %vm933_vm0 = vcmask (%p926_p5), 254976   ;;  %vm935_vm1 = vcmask (%p926_p5), 58368   ;;  %v2452_v1 = vmov (%p926_p5), 0.0  }
  0x1e   : > { %s2168_s2 = sshll.u32 %s2588_s25, 4  ;;  %s2169_s22 = sshll.u32 %s2588_s25, 3  ;;  %936 = vst.msk [vmem:[#allocation5] sm:$0x3] (%p926_p5), %vm935_vm1, %v2452_v1 }
  0x1f   : > { %s2611_s23 = scalar_lea.vmem %s2904_s10, %s2168_s2  ;;  %s2616_s28 = scalar_lea.vmem %s2905_s11, %s2169_s22 }
  0x20   : > { %s2625_s24 = scalar_lea.vmem %s2877_s13, %s2169_s22  ;;  %s898_s19 = scalar_lea.vmem %s2878_s14, %s2588_s25 }
  0x21   : > { %s2634_s9 = scalar_lea.vmem %s2879_s15, %s2168_s2  ;;  %s906_s11 = scalar_lea.vmem %s2880_s16, %s2588_s25 }
  0x22   : > { %s2643_s30 = scalar_lea.vmem %s2881_s17, %s2168_s2  ;;  %s2173_s22 = sshll.u32 %s2588_s25, 6 }
  0x23   : > { %s2649_s26 = scalar_lea.vmem %s2882_s18, %s2173_s22  ;;  %v932_v0 = vld [vmem:[%s2906_s20] sm:$0x3] (%p926_p5) }
  0x24   : > { %934 = vst.msk [vmem:[#allocation3] sm:$0x3] %vm933_vm0, %v932_v0 }
  0x25 PF: > { %vm943_vm2 = vcmask 254976   ;;  %v2333_v9 = vld [vmem:[%s2611_s23] sm:$0xff]   ;;  %v2453_v10 = vmov 0.0   ;;  %vm2454_vm3 = vmmov 0   ;;  %v2334_v11 = vld [vmem:[%s2611_s23 + $0x8] sm:$0xff]   ;;  %s2907_s23 = scalar_lea.vmem %s2870_s6, %s2588_s25  ;;  %s2908_s4 = scalar_lea.vmem %s2871_s7, %s2588_s25  ;;  %vm989_vm4 = vcmask 261120  }
  0x26   : > { %2210 = vmatprep.subr.bf16.mxu1 %v2453_v10  ;;  %2214 = vmatprep.mubr.msk.bf16.mxu1 %vm2454_vm3, %v2453_v10  ;;  %v2121_v16 = vld [vmem:[%s2907_s23] ss:$0 sm:$0xff]  ;;  %s2909_s0 = sld [smem:[#allocation13_spill]]  ;;  %vm1055_vm5 = vcmask 130048   ;;  %v2455_v25 = vmov 1966171168   ;;  %v1173_v27 = vlaneseq  ;;  %s2910_s10 = scalar_lea.vmem %s2876_s12, %s2588_s25 }
  0x27   : > { %2211 = vmatpush3.bf16.msra.mxu1 %v2333_v9  ;;  %2230 = vmatprep.subr.bf16.mxu0 %v2453_v10  ;;  %v2122_v18 = vld [vmem:[%s2908_s4] ss:$0 sm:$0xff]  ;;  %v1171_v26 = vunpack.c.l.s4 %v2455_v25  ;;  %s2911_s2 = sld [smem:[#allocation15_spill]]  ;;  %vm1384_vm6 = vcmask 1043456   ;;  %vm1332_vm7 = vcmask 60416   ;;  %vm1380_vm8 = vcmask 64512   ;;  %s2913_s21 = scalar_lea.vmem %s2872_s8, %s2588_s25 }
  0x28   : > { %2212 = vmatprep.subr.bf16.mxu1 %v2453_v10  ;;  %2232 = vmatprep.mubr.msk.bf16.mxu0 %vm2454_vm3, %v2453_v10  ;;  %v2335_v21 = vld [vmem:[%s2616_s28] sm:$0xff]   ;;  %v1174_v29 = vshrl.u32 %v1173_v27, 7  ;;  %vm1372_vm9 = vcmask 1041409   ;;  %vm1376_vm10 = vcmask 58368   ;;  %vm1476_vm11 = vcmask 257024   ;;  %p1796_p6 = scmp.eq.s32.totalorder %s2442_s1, 1 }
  0x29   : > { %v2337_v24 = vld [vmem:[%s2625_s24] sm:$0xff]   ;;  %v1172_v28 = vunpack.c.0.s8 %v1171_v26  ;;  %vm1597_vm12 = vcmask 253952   ;;  %s2917_s20 = sld [smem:[#allocation17_spill]] (%p1796_p6) }
  0x2a   : > { %v2126_v37 = vld [vmem:[%s2910_s10] ss:$0 sm:$0xff]  ;;  %v1194_v39 = vsub.s32 0, %v1174_v29 }
  0x2b   : > { %v2656_v2 = vld [vmem:[#allocation3] sm:$0x3]  ;;  %2213 = vmatpush3.bf16.msra.mxu1 %v2334_v11  ;;  %v1175_v30 = vsub.s32 %v1172_v28, %v1174_v29  ;;  %v2132_v58 = vld [vmem:[%s898_s19] ss:$0 sm:$0xff]  ;;  %s2912_s19 = sld [smem:[#allocation14_spill]] }
  0x2c   : > { %v944_v3 = vsel %vm943_vm2, %v2656_v2, 0.0  ;;  %2218 = vmatprep.subr.bf16.mxu1 %v2453_v10  ;;  %v2336_v23 = vld [vmem:[%s2909_s0] sm:$0xff]  }
  0x2d   : > { %945 = vadd.xlane.f32.xlu0 %v944_v3  ;;  %v2704_v49 = vld [vmem:[%s2911_s2] sm:$0xf] }
  0xba   : > { %v946_v4 = vpop.xlane.xlu0 %945 }
  0xbb   : > { %v948_v5 = vmul.f32 0.03125, %v946_v4 }
  0xbd   : > { %v949_v6 = vsub.f32 %v2656_v2, %v948_v5 }
  0xbf   : > { %v950_v7 = vmul.f32 %v949_v6, %v949_v6 }
  0xc1   : > { %v951_v8 = vsel %vm943_vm2, %v950_v7, 0.0 }
  0xc2   : > { %952 = vadd.xlane.f32.xlu0 %v951_v8 }
 0x14f   : > { %v953_v12 = vpop.xlane.xlu0 %952 }
 0x150   : > { %v954_v13 = vmul.f32 0.03125, %v953_v12 }
 0x152   : > { %v955_v14 = vadd.f32 1e-05, %v954_v13 }
 0x154   : > { %2350 = vrsqrt.f32 %v955_v14 }
 0x15e   : > { %v2351_v15 = vpop.eup %2350 }
 0x15f   : > { %v957_v17 = vmul.f32 %v2351_v15, %v949_v6  ;;  %v2137_v6 = vld.sshfl [vmem:[%s2912_s19] sm:$0x11 pattern:$0x75316420] }
 0x160   : > { %v1215_v7 = vcombine.high %v2137_v6, %v2137_v6  ;;  %v1222_v8 = vrot.slane %v2137_v6, %v1175_v30 }
 0x161   : > { %v964_v19 = vmul.f32 %v2121_v16, %v957_v17 }
 0x162   : > { %v1229_v9 = vrot.slane %v1215_v7, %v1175_v30  ;;  %v1233_v11 = vrot.slane %v1222_v8, %v1194_v39 }
 0x163   : > { %v971_v20 = vadd.f32 %v2122_v18, %v964_v19 }
 0x164   : > { %v1237_v12 = vrot.slane %v1229_v9, %v1194_v39 }
 0x165   : > { %v972_v22 = vpack.c.bf16 %v971_v20, %v971_v20 }
 0x167   : > { %2215 = vmatmul.mubr.msk.bf16.vlgmr.msra.gmra.mrb[0].mxu1 %vm989_vm4, %v972_v22 }
 0x168   : > { %2219 = vmatpush3.bf16.msra.mxu1 %v2335_v21  ;;  %2220 = vmatprep.mubr.msk.bf16.mxu1 %vm2454_vm3, %v2453_v10 }
 0x169   : > { %2224 = vmatprep.subr.bf16.mxu1 %v2453_v10 }
 0x16f   : > { %2221 = vmatmul.mubr.msk.bf16.vlgmr.msra.gmra.mrb[4].mxu1 %vm1055_vm5, %v2336_v23 }
 0x170   : > { %2226 = vmatprep.mubr.msk.bf16.mxu1 %vm2454_vm3, %v2453_v10  ;;  %2225 = vmatpush3.bf16.msra.mxu1 %v2337_v24 }
 0x171   : > { %2236 = vmatprep.subr.bf16.mxu1 %v2453_v10 }
 0x177   : > { %2227 = vmatmul.mubr.msk.bf16.vlgmr.msra.gmra.mrb[8].mxu1 %vm1055_vm5, %v2336_v23 }
 0x178   : > { %2238 = vmatprep.mubr.msk.bf16.mxu1 %vm2454_vm3, %v2453_v10 }
 0x23a   : > { %v1027_v31 = vpop.f32.mrb[0].mxu1 }
 0x23b   : > { %v1176_v32 = vrot.slane %v1027_v31, %v1175_v30  ;;  %v2216_v33 = vpop.f32.mrb[1].mxu1 }
 0x23c   : > { %v1030_v34 = vpop.f32.mrb[2].mxu1 }
 0x23d   : > { %v2217_v35 = vpop.f32.mrb[3].mxu1  ;;  %v1177_v36 = vcombine.high %v1176_v32, %v1176_v32  ;;  %v1184_v38 = vrot.slane %v1176_v32, %v1175_v30 }
 0x23f   : > { %v1191_v41 = vrot.slane %v1177_v36, %v1175_v30  ;;  %v1195_v45 = vrot.slane %v1184_v38, %v1194_v39 }
 0x241   : > { %v1199_v50 = vrot.slane %v1191_v41, %v1194_v39  ;;  %v1202_v53 = vmul.f32 %v1195_v45, %v2704_v49 }
 0x242   : > { %v1093_v40 = vpop.f32.mrb[4].mxu1 }
 0x243   : > { %v1094_v42 = vadd.f32 %v2126_v37, %v1093_v40  ;;  %v2222_v43 = vpop.f32.mrb[5].mxu1  ;;  %v1203_v55 = vmul.f32 %v1199_v50, %v2704_v49  ;;  %v1204_v56 = vpack.c.bf16 %v1202_v53, %v1202_v53 }
 0x244   : > { %v1096_v44 = vpop.f32.mrb[6].mxu1 }
 0x245   : > { %v2175_v46 = vpack.c.bf16 %v1094_v42, %v1094_v42  ;;  %v1097_v47 = vadd.f32 %v2126_v37, %v1096_v44  ;;  %v2223_v48 = vpop.f32.mrb[7].mxu1  ;;  %v1205_v57 = vpack.c.bf16 %v1203_v55, %v1203_v55 }
 0x247   : > { %v2176_v51 = vpack.c.bf16 %v1097_v47, %v1097_v47  ;;  %v1244_v52 = vsel %vm989_vm4, %v2175_v46, 0 }
 0x248   : > { %2231 = vmatpush3.bf16.xpose.msra.mxu0 %v1244_v52 }
 0x249   : > { %v1290_v54 = vsel %vm989_vm4, %v2176_v51, 0  ;;  %2242 = vmatprep.subr.bf16.mxu0 %v2453_v10 }
 0x24a   : > { %2237 = vmatpush3.bf16.xpose.msra.mxu1 %v1290_v54  ;;  %v1155_v59 = vpop.f32.mrb[8].mxu1 }
 0x24b   : > { %2248 = vmatprep.subr.bf16.mxu1 %v2453_v10  ;;  %v1156_v60 = vadd.f32 %v2132_v58, %v1155_v59  ;;  %v2228_v61 = vpop.f32.mrb[9].mxu1 }
 0x24c   : > { %v1158_v62 = vpop.f32.mrb[10].mxu1  ;;  %v2338_v61 = vld [vmem:[%s2634_s9] sm:$0xff]  }
 0x24d   : > { %v2177_v63 = vpack.c.bf16 %v1156_v60, %v1156_v60  ;;  %v1159_v0 = vadd.f32 %v2132_v58, %v1158_v62  ;;  %v2229_v1 = vpop.f32.mrb[11].mxu1  ;;  %v1355_v58 = vld [vmem:[#allocation5] sm:$0x3]  ;;  %v2339_v62 = vld [vmem:[%s2634_s9 + $0x8] sm:$0xff]  }
 0x24f   : > { %2233 = vmatmul.mubr.msk.bf16.vlgmr.msra.gmra.mrb[0].mxu0 %vm989_vm4, %v1204_v56  ;;  %v1386_v3 = vsel %vm1384_vm6, %v2177_v63, 0  ;;  %v2178_v4 = vpack.c.bf16 %v1159_v0, %v1159_v0 }
 0x250   : > { %2244 = vmatprep.mubr.msk.bf16.mxu0 %vm2454_vm3, %v2453_v10  ;;  %2243 = vmatpush3.bf16.msra.mxu0 %v1386_v3 }
 0x251   : > { %2239 = vmatmul.mubr.msk.bf16.vlgmr.msra.gmra.mrb[12].mxu1 %vm989_vm4, %v1205_v57  ;;  %v1432_v5 = vsel %vm1384_vm6, %v2178_v4, 0  ;;  %2254 = vmatprep.subr.bf16.mxu0 %v2453_v10 }
 0x252   : > { %2250 = vmatprep.mubr.msk.bf16.mxu1 %vm2454_vm3, %v2453_v10  ;;  %2249 = vmatpush3.bf16.msra.mxu1 %v1432_v5 }
 0x253   : > { %2262 = vmatprep.subr.bf16.mxu1 %v2453_v10 }
 0x322   : > { %v1280_v13 = vpop.f32.mrb[0].mxu0 }
 0x323   : > { %v1281_v14 = vadd.f32 %v1280_v13, %v1233_v11  ;;  %v2234_v15 = vpop.f32.mrb[1].mxu0 }
 0x324   : > { %v1283_v16 = vpop.f32.mrb[2].mxu0  ;;  %v1326_v17 = vpop.f32.mrb[12].mxu1 }
 0x325   : > { %v1327_v18 = vadd.f32 %v1326_v17, %v1237_v12  ;;  %v2235_v19 = vpop.f32.mrb[3].mxu0  ;;  %v2240_v20 = vpop.f32.mrb[13].mxu1  ;;  %v1333_v21 = vsel %vm1332_vm7, %v1281_v14, -inf }
 0x326   : > { %1334 = vmax.xlane.f32.xlu1 %v1333_v21  ;;  %v1329_v22 = vpop.f32.mrb[14].mxu1 }
 0x327   : > { %v2241_v23 = vpop.f32.mrb[15].mxu1  ;;  %v1336_v24 = vsel %vm1332_vm7, %v1327_v18, -inf }
 0x32a   : > { %1337 = vmax.xlane.f32.xlu1 %v1336_v24 }
 0x3b3   : > { %v1335_v25 = vpop.xlane.xlu1 %1334 }
 0x3b4   : > { %v1339_v26 = vsub.f32 %v1281_v14, %v1335_v25 }
 0x3b6   : > { %v1341_v27 = vmul.f32 1.442695, %v1339_v26 }
 0x3b7   : > { %v1338_v28 = vpop.xlane.xlu1 %1337 }
 0x3b8   : > { %2352 = vpow2.f32 %v1341_v27  ;;  %v1340_v29 = vsub.f32 %v1327_v18, %v1338_v28 }
 0x3ba   : > { %v1343_v30 = vmul.f32 1.442695, %v1340_v29 }
 0x3bc   : > { %2354 = vpow2.f32 %v1343_v30  ;;  %v2142_v30 = vld [vmem:[%s906_s11] ss:$0 sm:$0xff] }
 0x3c2   : > { %v2353_v31 = vpop.eup %2352 }
 0x3c3   : > { %v1345_v32 = vsel %vm1332_vm7, %v2353_v31, 0.0 }
 0x3c4   : > { %1346 = vadd.xlane.f32.xlu0 %v1345_v32 }
 0x3c6   : > { %v2355_v33 = vpop.eup %2354 }
 0x3c7   : > { %v1348_v34 = vsel %vm1332_vm7, %v2355_v33, 0.0 }
 0x3c8   : > { %1349 = vadd.xlane.f32.xlu1 %v1348_v34 }
 0x451   : > { %v1347_v35 = vpop.xlane.xlu0 %1346 }
 0x452   : > { %2356 = vrcp.f32 %v1347_v35 }
 0x455   : > { %v1350_v36 = vpop.xlane.xlu1 %1349 }
 0x456   : > { %2358 = vrcp.f32 %v1350_v36 }
 0x45c   : > { %v2357_v37 = vpop.eup %2356 }
 0x45d   : > { %v1353_v38 = vmul.f32 %v2357_v37, %v2353_v31 }
 0x45f   : > { %v1356_v39 = vsel %vm1332_vm7, %v1353_v38, 0.0  ;;  %v1378_v40 = vpack.c.bf16 %v1353_v38, %v1353_v38 }
 0x460   : > { %v2359_v41 = vpop.eup %2358  ;;  %v1357_v42 = vrot.slane %v1356_v39, 4 }
 0x461   : > { %v1354_v43 = vmul.f32 %v2359_v41, %v2355_v33  ;;  %2245 = vmatmul.mubr.msk.bf16.vlgmr.msra.gmra.mrb[4].mxu0 %vm1380_vm8, %v1378_v40 }
 0x462   : > { %v1358_v44 = vadd.f32 %v1357_v42, %v1356_v39  ;;  %2258 = vmatprep.mubr.msk.bf16.mxu0 %vm2454_vm3, %v2453_v10  ;;  %2255 = vmatpush3.bf16.msra.mxu0 %v2338_v61  ;;  %v2347_v61 = vld [vmem:[%s2649_s26 + $0x28] sm:$0xff]  }
 0x463   : > { %v1363_v45 = vsel %vm1332_vm7, %v1354_v43, 0.0  ;;  %v1379_v46 = vpack.c.bf16 %v1354_v43, %v1354_v43  ;;  %2256 = vmatprep.subr.bf16.mxu0 %v2453_v10  ;;  %v2340_v43 = vld [vmem:[%s2643_s30] sm:$0xff]  }
 0x464   : > { %v1359_v47 = vrot.slane %v1358_v44, 2  ;;  %v1364_v48 = vrot.slane %v1363_v45, 4 }
 0x465   : > { %2251 = vmatmul.mubr.msk.bf16.vlgmr.msra.gmra.mrb[16].mxu1 %vm1380_vm8, %v1379_v46 }
 0x466   : > { %v1360_v50 = vadd.f32 %v1359_v47, %v1358_v44  ;;  %v1365_v51 = vadd.f32 %v1364_v48, %v1363_v45  ;;  %2266 = vmatprep.mubr.msk.bf16.mxu1 %vm2454_vm3, %v2453_v10  ;;  %2257 = vmatpush3.bf16.msra.mxu0 %v2339_v62  ;;  %v2341_v44 = vld [vmem:[%s2643_s30 + $0x8] sm:$0xff]   ;;  %v2146_v48 = vld [vmem:[%s2913_s21] ss:$0 sm:$0xff]  ;;  %s2914_s30 = sld [smem:[#allocation18_spill]]  ;;  %v2348_v62 = vld [vmem:[%s2649_s26 + $0x30] sm:$0xff]  }
 0x467   : > { %2270 = vmatprep.subr.bf16.mxu0 %v2453_v10  ;;  %2263 = vmatpush3.bf16.msra.mxu1 %v2340_v43 }
 0x468   : > { %v1366_v52 = vrot.slane %v1365_v51, 2  ;;  %v1361_v53 = vrot.slane %v1360_v50, 1  ;;  %2264 = vmatprep.subr.bf16.mxu1 %v2453_v10 }
 0x46a   : > { %v1367_v54 = vadd.f32 %v1366_v52, %v1365_v51  ;;  %v1362_v56 = vadd.f32 %v1361_v53, %v1360_v50 }
 0x46b   : > { %2265 = vmatpush3.bf16.msra.mxu1 %v2341_v44 }
 0x46c   : > { %v1368_v55 = vrot.slane %v1367_v54, 1  ;;  %s2915_s24 = scalar_lea.vmem %s2914_s30, %s2588_s25 }
 0x46d   : > { %v2147_v51 = vld [vmem:[%s2915_s24] ss:$0 sm:$0xff] }
 0x46e   : > { %v1369_v57 = vadd.f32 %v1368_v55, %v1367_v54 }
 0x470   : > { %v1373_v59 = vsel %vm1372_vm9, %v1369_v57, %v1362_v56  ;;  %v2342_v56 = vld [vmem:[%s2649_s26] sm:$0xff]   ;;  %v2343_v57 = vld [vmem:[%s2649_s26 + $0x8] sm:$0xff]  }
 0x471   : > { %v1375_v60 = vadd.f32 %v1373_v59, %v1355_v58  ;;  %v2344_v58 = vld [vmem:[%s2649_s26 + $0x10] sm:$0xff]   ;;  %v2345_v59 = vld [vmem:[%s2649_s26 + $0x18] sm:$0xff]  }
 0x473   : > { %1377 = vst.msk [vmem:[#allocation5] sm:$0x3] %vm1376_vm10, %v1375_v60  ;;  %v2346_v60 = vld [vmem:[%s2649_s26 + $0x20] sm:$0xff]  }
 0x534   : > { %v1422_v63 = vpop.f32.mrb[4].mxu0 }
 0x535   : > { %v1474_v0 = vmul.f32 %v1422_v63, %v2704_v49  ;;  %v2246_v1 = vpop.f32.mrb[5].mxu0  ;;  %v2349_v63 = vld [vmem:[%s2649_s26 + $0x38] sm:$0xff]   ;;  %s2916_s26 = sld [smem:[#allocation16_spill]] (%p1796_p6) }
 0x536   : > { %v1425_v3 = vpop.f32.mrb[6].mxu0 }
 0x537   : > { %v1477_v4 = vsel %vm1476_vm11, %v1474_v0, 0.0  ;;  %v2247_v5 = vpop.f32.mrb[7].mxu0 }
 0x538   : > { %v1478_v6 = vrot.slane %v1477_v4, 4  ;;  %v1468_v7 = vpop.f32.mrb[16].mxu1 }
 0x539   : > { %v1475_v8 = vmul.f32 %v1468_v7, %v2704_v49  ;;  %v2252_v9 = vpop.f32.mrb[17].mxu1 }
 0x53a   : > { %v1479_v11 = vadd.f32 %v1478_v6, %v1477_v4  ;;  %v1471_v12 = vpop.f32.mrb[18].mxu1 }
 0x53b   : > { %v1484_v13 = vsel %vm1476_vm11, %v1475_v8, 0.0  ;;  %v2253_v14 = vpop.f32.mrb[19].mxu1 }
 0x53c   : > { %v1480_v15 = vrot.slane %v1479_v11, 2  ;;  %v1485_v16 = vrot.slane %v1484_v13, 4 }
 0x53e   : > { %v1481_v17 = vadd.f32 %v1480_v15, %v1479_v11  ;;  %v1486_v18 = vadd.f32 %v1485_v16, %v1484_v13 }
 0x540   : > { %v1482_v19 = vrot.slane %v1481_v17, 1  ;;  %v1487_v20 = vrot.slane %v1486_v18, 2 }
 0x542   : > { %v1483_v21 = vadd.f32 %v1482_v19, %v1481_v17  ;;  %v1488_v22 = vadd.f32 %v1487_v20, %v1486_v18 }
 0x544   : > { %v1489_v23 = vrot.slane %v1488_v22, 1  ;;  %v1491_v24 = vpack.c.bf16 %v1483_v21, %v1483_v21 }
 0x546   : > { %v1490_v25 = vadd.f32 %v1489_v23, %v1488_v22  ;;  %v1506_v27 = vunpack.c.l.b16 %v1491_v24 }
 0x548   : > { %v1492_v26 = vpack.c.bf16 %v1490_v25, %v1490_v25  ;;  %v2456_v25 = vmov -1.0  }
 0x54a   : > { %v1507_v49 = vunpack.c.l.b16 %v1492_v26 }
 0x54c   : > { %v1508_v28 = vsel %vm1372_vm9, %v1507_v49, %v1506_v27 }
 0x54d   : > { %v1509_v29 = vpack.c.b16 %v1508_v28, %v1508_v28 }
 0x54f   : > { %2259 = vmatmul.mubr.msk.bf16.vlgmr.msra.gmra.mrb[8].mxu0 %vm989_vm4, %v1509_v29 }
 0x550   : > { %2286 = vmatprep.mubr.msk.bf16.mxu0 %vm2454_vm3, %v2453_v10  ;;  %2271 = vmatpush3.bf16.msra.mxu0 %v2342_v56 }
 0x551   : > { %2272 = vmatprep.subr.bf16.mxu0 %v2453_v10 }
 0x554   : > { %2273 = vmatpush3.bf16.msra.mxu0 %v2343_v57 }
 0x555   : > { %2274 = vmatprep.subr.bf16.mxu0 %v2453_v10 }
 0x558   : > { %2275 = vmatpush3.bf16.msra.mxu0 %v2344_v58 }
 0x559   : > { %2276 = vmatprep.subr.bf16.mxu0 %v2453_v10 }
 0x55c   : > { %2277 = vmatpush3.bf16.msra.mxu0 %v2345_v59 }
 0x55d   : > { %2278 = vmatprep.subr.bf16.mxu0 %v2453_v10 }
 0x560   : > { %2279 = vmatpush3.bf16.msra.mxu0 %v2346_v60 }
 0x561   : > { %2280 = vmatprep.subr.bf16.mxu0 %v2453_v10 }
 0x564   : > { %2281 = vmatpush3.bf16.msra.mxu0 %v2347_v61 }
 0x565   : > { %2282 = vmatprep.subr.bf16.mxu0 %v2453_v10 }
 0x568   : > { %2283 = vmatpush3.bf16.msra.mxu0 %v2348_v62 }
 0x569   : > { %2284 = vmatprep.subr.bf16.mxu0 %v2453_v10 }
 0x56c   : > { %2285 = vmatpush3.bf16.msra.mxu0 %v2349_v63 }
 0x622   : > { %v1559_v31 = vpop.f32.mrb[8].mxu0 }
 0x623   : > { %v1560_v32 = vadd.f32 %v2142_v30, %v1559_v31  ;;  %v2260_v33 = vpop.f32.mrb[9].mxu0 }
 0x624   : > { %v1562_v34 = vpop.f32.mrb[10].mxu0 }
 0x625   : > { %v1565_v35 = vadd.f32 %v1560_v32, %v2656_v2  ;;  %v2261_v36 = vpop.f32.mrb[11].mxu0 }
 0x627   : > { %1566 = vst.msk [vmem:[#allocation3] sm:$0x3] %vm943_vm2, %v1565_v35  ;;  %v1569_v37 = vsel %vm943_vm2, %v1565_v35, 0.0 }
 0x628   : > { %1570 = vadd.xlane.f32.xlu0 %v1569_v37 }
 0x62e   : > { %v1687_v31 = vld [vmem:[#allocation3] sm:$0x3] }
 0x6b5   : > { %v1571_v38 = vpop.xlane.xlu0 %1570 }
 0x6b6   : > { %v1572_v39 = vmul.f32 0.03125, %v1571_v38 }
 0x6b8   : > { %v1573_v40 = vsub.f32 %v1565_v35, %v1572_v39 }
 0x6ba   : > { %v1574_v41 = vmul.f32 %v1573_v40, %v1573_v40 }
 0x6bc   : > { %v1575_v42 = vsel %vm943_vm2, %v1574_v41, 0.0 }
 0x6bd   : > { %1576 = vadd.xlane.f32.xlu1 %v1575_v42 }
 0x74a   : > { %v1577_v2 = vpop.xlane.xlu1 %1576 }
 0x74b   : > { %v1578_v45 = vmul.f32 0.03125, %v1577_v2 }
 0x74d   : > { %v1579_v46 = vadd.f32 1e-05, %v1578_v45 }
 0x74f   : > { %2360 = vrsqrt.f32 %v1579_v46 }
 0x759   : > { %v2361_v47 = vpop.eup %2360 }
 0x75a   : > { %v1581_v50 = vmul.f32 %v2361_v47, %v1573_v40  ;;  %v2160_v47 = vld [vmem:[%s2916_s26] ss:$0 sm:$0xff] (%p1796_p6) }
 0x75c   : > { %v1588_v52 = vmul.f32 %v2146_v48, %v1581_v50  ;;  %v2161_v50 = vld [vmem:[%s2917_s20] ss:$0 sm:$0xff] (%p1796_p6) }
 0x75e   : > { %v1595_v53 = vadd.f32 %v2147_v51, %v1588_v52 }
 0x760   : > { %v1596_v54 = vpack.c.bf16 %v1595_v53, %v1595_v53 }
 0x762   : > { %1598 = vst.msk [vmem:[#allocation2] sm:$0x1] %vm1597_vm12, %v1596_v54 }
 0x769   : > { %v1599_v55 = vld [vmem:[#allocation2] sm:$0x1] }
 0x76a   : > { %2267 = vmatmul.mubr.msk.bf16.vlgmr.msra.gmra.mrb[20].mxu1 %vm989_vm4, %v1599_v55 }
 0x83d   : > { %v1654_v0 = vpop.f32.mrb[20].mxu1 }
 0x83e   : > { %v1661_v1 = vmul.f32 0.70710677, %v1654_v0  ;;  %v2268_v3 = vpop.f32.mrb[21].mxu1  ;;  %v1660_v49 = vmul.f32 0.5, %v1654_v0 }
 0x83f   : > { %v1657_v4 = vpop.f32.mrb[22].mxu1 }
 0x840   : > { %v1664_v5 = vand.u32 2147483647, %v1661_v1  ;;  %v2269_v6 = vpop.f32.mrb[23].mxu1  ;;  %vm1662_vm13 = vcmp.ge.f32.partialorder %v1661_v1, 0.0 }
 0x841   : > { %v1663_v26 = vsel %vm1662_vm13, 1.0, %v2456_v25 }
 0x842   : > { %v1665_v7 = vmul.f32 0.3275911, %v1664_v5  ;;  %v1678_v9 = vsub.f32 0.0, %v1664_v5 }
 0x844   : > { %v1666_v8 = vadd.f32 1.0, %v1665_v7  ;;  %v1679_v12 = vmul.f32 %v1678_v9, %v1664_v5 }
 0x846   : > { %2362 = vrcp.f32 %v1666_v8  ;;  %v1680_v15 = vmul.f32 1.442695, %v1679_v12 }
 0x848   : > { %2364 = vpow2.f32 %v1680_v15 }
 0x850   : > { %v2363_v11 = vpop.eup %2362 }
 0x851   : > { %v1669_v13 = vmul.f32 1.0614054, %v2363_v11 }
 0x852   : > { %v2365_v22 = vpop.eup %2364 }
 0x853   : > { %v1670_v14 = vadd.f32 -1.4531521, %v1669_v13 }
 0x855   : > { %v1671_v16 = vmul.f32 %v2363_v11, %v1670_v14 }
 0x857   : > { %v1672_v17 = vadd.f32 1.4214138, %v1671_v16 }
 0x859   : > { %v1673_v10 = vmul.f32 %v2363_v11, %v1672_v17 }
 0x85b   : > { %v1674_v18 = vadd.f32 -0.28449672, %v1673_v10 }
 0x85d   : > { %v1675_v19 = vmul.f32 %v2363_v11, %v1674_v18 }
 0x85f   : > { %v1676_v20 = vadd.f32 0.2548296, %v1675_v19 }
 0x861   : > { %v1677_v21 = vmul.f32 %v2363_v11, %v1676_v20 }
 0x863   : > { %v1682_v23 = vmul.f32 %v2365_v22, %v1677_v21 }
 0x865   : > { %v1683_v24 = vsub.f32 1.0, %v1682_v23 }
 0x867   : > { %v1684_v27 = vmul.f32 %v1683_v24, %v1663_v26 }
 0x869   : > { %v1685_v28 = vadd.f32 1.0, %v1684_v27 }
 0x86b   : > { %v1686_v29 = vmul.f32 %v1685_v28, %v1660_v49 }
 0x86d   : > { %v1688_v30 = vpack.c.bf16 %v1686_v29, %v1686_v29 }
 0x86f   : > { %2287 = vmatmul.mubr.bf16.vlgmr.msra.gmra.mrb[12].mxu0 %v1688_v30 }
 0x93f   : > { %1800 = sbr.rel (!%p1796_p6) target bundleno = 2695 (0xa87), region = 108 }
 0x942   : > { %v1787_v32 = vpop.f32.mrb[12].mxu0 }
 0x943   : > { %v1793_v33 = vadd.f32 %v1787_v32, %v1687_v31  ;;  %v2288_v34 = vpop.f32.mrb[13].mxu0 }
 0x944   : > { %v1790_v35 = vpop.f32.mrb[14].mxu0 }
 0x945   : > { %1795 = vst.msk [vmem:[#allocation3] sm:$0x3] %vm943_vm2, %v1793_v33  ;;  %v2289_v36 = vpop.f32.mrb[15].mxu0 }
 0x94c   : > { %v1801_v37 = vld [vmem:[#allocation3] sm:$0x3] }
 0x94d   : > { %v1804_v38 = vsel %vm943_vm2, %v1801_v37, 0.0 }
 0x94e   : > { %1805 = vadd.xlane.f32.xlu0 %v1804_v38 }
 0x9db   : > { %v1806_v39 = vpop.xlane.xlu0 %1805 }
 0x9dc   : > { %v1808_v40 = vmul.f32 0.03125, %v1806_v39 }
 0x9de   : > { %v1809_v41 = vsub.f32 %v1801_v37, %v1808_v40 }
 0x9e0   : > { %v1810_v42 = vmul.f32 %v1809_v41, %v1809_v41 }
 0x9e2   : > { %v1811_v43 = vsel %vm943_vm2, %v1810_v42, 0.0 }
 0x9e3   : > { %1812 = vadd.xlane.f32.xlu0 %v1811_v43 }
 0xa70   : > { %v1813_v44 = vpop.xlane.xlu0 %1812 }
 0xa71   : > { %v1814_v2 = vmul.f32 0.03125, %v1813_v44 }
 0xa73   : > { %v1815_v45 = vadd.f32 1e-05, %v1814_v2 }
 0xa75   : > { %2366 = vrsqrt.f32 %v1815_v45 }
 0xa7f   : > { %v2367_v46 = vpop.eup %2366 }
 0xa80   : > { %v1817_v48 = vmul.f32 %v2367_v46, %v1809_v41 }
 0xa82   : > { %v1824_v51 = vmul.f32 %v2160_v47, %v1817_v48 }
 0xa84   : > { %v1831_v52 = vadd.f32 %v2161_v50, %v1824_v51 }
 0xa86   : > { %1832 = vst.msk [vmem:[#allocation3] sm:$0x3] %vm943_vm2, %v1831_v52 }
 0xa87 PF: > { %s2918_s2 = sld [smem:[#allocation10_spill]]  ;;  %s2457_s27 = smov [#allocation3]  }
 0xa88   : > { %s1842_s29 = sshll.u32 %s2457_s27, 4  ;;  %s2458_s19 = smov [#allocation5]   ;;  %s1843_s29 = int_to_ptr.vmem [resolvable:$true] %s1842_s29 }
 0xa89   : > { %s1855_s9 = sshll.u32 %s2458_s19, 4  ;;  %s2368_s4 = scalar_lea.vmem %s1843_s29, 32  ;;  %s2804_s9 = int_to_ptr.vmem [resolvable:$true] %s1855_s9 }
 0xa8a   : > { %p2369_p8 = scmp.ne.s32.totalorder %s1843_s29, %s2368_s4  ;;  %p2375_p11 = scmp.lt.s32.totalorder %s1843_s29, %s1843_s29 }
 0xa8b   : > { %p2376_p12 = scmp.lt.s32.totalorder %s2368_s4, %s2368_s4 }
 0xa8d   : > { %s2919_s5 = sadd.s32 4294967295, %s2918_s2   ;;  %p2377_p13 = por %p2376_p12, %p2375_p11 }
 0xa8e   : > { %p2800_p7 = scmp.eq.s32.totalorder %s2919_s5, 1 }
 0xa90   : > { %p2370_p9 = pnand %p2369_p8, %p2800_p7 }
 0xa92   : > { %p2371_p10 = pneg %p2370_p9 }
 0xa94   : > { %p2378_p0 = pnand %p2377_p13, %p2371_p10 }
 0xa96   : > { %2381 = shalt.err (!%p2378_p0)
}
 0xa97   : > { %s2921_s21 = sld [smem:[#allocation21_spill]] }
 0xa9d   : > { %s2382_s0 = scalar_lea.hbm %s2921_s21, 32 }
 0xa9e   : > { %p2383_p1 = scmp.ne.s32.totalorder %s2921_s21, %s2382_s0  ;;  %p2388_p4 = scmp.lt.u32.totalorder %s2382_s0, %s2921_s21 }
 0xaa0   : > { %p2384_p2 = pnand %p2383_p1, %p2800_p7 }
 0xaa2   : > { %p2385_p3 = pneg %p2384_p2 }
 0xaa4   : > { %p2390_p5 = pnand %p2388_p4, %p2385_p3 }
 0xaa6   : > { %2393 = shalt.err (!%p2390_p5)
}
 0xaa7   : > { %2291 = dma.vmem_to_hbm [thread:$0]  (%p2800_p7), %s1843_s29, 32, %s2921_s21, [#allocation4]  }
 0xaa8   : > { %s2394_s10 = scalar_lea.vmem %s2804_s9, 32  ;;  %p2401_p10 = scmp.lt.s32.totalorder %s2804_s9, %s2804_s9 }
 0xaa9   : > { %p2395_p6 = scmp.ne.s32.totalorder %s2804_s9, %s2394_s10  ;;  %p2402_p11 = scmp.lt.s32.totalorder %s2394_s10, %s2394_s10 }
 0xaab   : > { %p2396_p8 = pnand %p2395_p6, %p2800_p7  ;;  %p2403_p12 = por %p2402_p11, %p2401_p10 }
 0xaad   : > { %p2397_p9 = pneg %p2396_p8 }
 0xaaf   : > { %p2404_p13 = pnand %p2403_p12, %p2397_p9 }
 0xab1   : > { %2407 = shalt.err (!%p2404_p13)
}
 0xab2   : > { %s2922_s2 = sld [smem:[#allocation22_spill]] }
 0xab8   : > { %s2408_s5 = scalar_lea.hbm %s2922_s2, 32 }
 0xab9   : > { %p2409_p0 = scmp.ne.s32.totalorder %s2922_s2, %s2408_s5  ;;  %p2414_p3 = scmp.lt.u32.totalorder %s2408_s5, %s2922_s2 }
 0xabb   : > { %p2410_p1 = pnand %p2409_p0, %p2800_p7 }
 0xabd   : > { %p2411_p2 = pneg %p2410_p1 }
 0xabf   : > { %p2416_p4 = pnand %p2414_p3, %p2411_p2 }
 0xac1   : > { %2419 = shalt.err (!%p2416_p4)
}
 0xac2   : > { %2293 = dma.vmem_to_hbm [thread:$0]  (%p2800_p7), %s2804_s9, 32, %s2922_s2, [#allocation6]  }
 0xac3   : > { %2433 = dma.done.wait (%p2800_p7), [#allocation4], 32  }
 0xac4   : > { %2435 = vsyncadd (%p2800_p7), [#allocation4], 4294967264 }
 0xac5   : > { %2437 = dma.done.wait (%p2800_p7), [#allocation6], 32  }
 0xac6   : > { %2439 = vsyncadd (%p2800_p7), [#allocation6], 4294967264 }
 0xac7 PF: > { %s2923_s0 = sld [smem:[#allocation10_spill]]  ;;  %s2924_s1 = sld [smem:[#allocation9_spill]] }
 0xac8   : > { %s2925_s22 = sld [smem:[#allocation11_spill]] }
 0xacd   : > { %s33_s23 = sadd.s32 1, %s2923_s0  }
 0xace   : > { %p30_p5 = scmp.ge.s32.totalorder %s33_s23, 4  }
 0xad0   :  { %32 = sbr.rel (!%p30_p5) target bundleno = 15 (0xf), region = 190 }
 0xad7   :  { %1872 = vsyncpa [#allocation4], 1 }
 0xad8   :  { %1874 = vsyncpa [#allocation4 + $0x1], 1 }
 0xad9   :  { %1875 = vsyncpa [#allocation6], 1 }

</bundles_post_ra>
